<compile_context>
chip_gen: v5e
topology: v5e:2x2
jax: 0.10.0
libtpu: 0.0.40
codegen_flags: <defaults>
</compile_context>

<pallas_src>
import math
import functools

import jax
import jax.numpy as jnp
from jax.experimental import pallas as pl
from jax.experimental.pallas import tpu as pltpu


# ----------------------------------------------------------------------------
# In-kernel math helpers (operate on plain jnp arrays loaded from VMEM refs)
# ----------------------------------------------------------------------------
def _layernorm(x, g, b, eps=1e-5):
    # x: [N, E] f32, g/b: [1, E] f32.  Stats kept in f32 (VPU path).
    mu = jnp.mean(x, axis=-1, keepdims=True)
    xc = x - mu
    var = jnp.mean(xc * xc, axis=-1, keepdims=True)
    return xc * jax.lax.rsqrt(var + eps) * g + b


def _mha(q, k, v, wo, bo, nhead):
    """All-heads multi-head attention.

    q: [bt, Lq, E] f32 (1/sqrt(dh) pre-folded into the Q projection),
    k/v: [bt, Lk, E] f32, wo: [nhead, dh, E] bf16, bo: [1, E] f32.
    Returns [bt*Lq, E] f32.

    Heads are moved onto the leading (batch) axis so scores / softmax / PV are
    each a single fused op over all heads, and the output projection is one
    batched matmul + a head reduction (no per-head wo matmuls, no nhead live
    f32 accumulators).  The head split uses lane slices + a leading-axis
    concat (both proven to lower) rather than a 4-D transpose.
    """
    bt, Lq, E = q.shape
    dh = E // nhead

    def split_heads(t):
        tb = t.astype(jnp.bfloat16)                       # hoisted cast
        return jnp.concatenate(
            [tb[:, :, h * dh:(h + 1) * dh] for h in range(nhead)], axis=0)

    qh = split_heads(q)                                   # [H*bt, Lq, dh]
    kh = split_heads(k)                                   # [H*bt, Lk, dh]
    vh = split_heads(v)                                   # [H*bt, Lk, dh]

    s = jnp.einsum("bqd,bkd->bqk", qh, kh,
                   preferred_element_type=jnp.float32)    # [H*bt, Lq, Lk]
    s = s - jnp.max(s, axis=-1, keepdims=True)
    p = jnp.exp(s)
    p = p * pl.reciprocal(jnp.sum(p, axis=-1, keepdims=True), approx=True)
    oh = jnp.einsum("bqk,bkd->bqd", p.astype(jnp.bfloat16), vh,
                    preferred_element_type=jnp.float32)   # [H*bt, Lq, dh]

    # Output projection: equivalent to concat(heads) @ Wo, expressed as one
    # batched matmul against per-head Wo slabs followed by a reduction over
    # heads (avoids a lane-dim concatenation of head outputs).
    wo_b = jnp.broadcast_to(wo[:, None, :, :], (nhead, bt, dh, E))
    wo_b = wo_b.reshape(nhead * bt, dh, E)                # [H*bt, dh, E]
    proj = jnp.einsum("bqd,bde->bqe", oh.astype(jnp.bfloat16), wo_b,
                      preferred_element_type=jnp.float32)  # [H*bt, Lq, E]
    proj = proj.reshape(nhead, bt, Lq, E)
    o = jnp.sum(proj, axis=0).reshape(bt * Lq, E)          # [bt*Lq, E]
    return o + bo


def _encoder_layer(x, w, nhead):
    """One encoder block on the current batch tile.  x: [bt, S, E] f32."""
    (wq, bq, wk, bk, wv, bv, wo, bo,
     ln1g, ln1b, w1, b1, w2, b2, ln2g, ln2b) = w
    bt, S, E = x.shape
    x2 = x.reshape(bt * S, E)
    xb = x2.astype(jnp.bfloat16)

    # Three separate [E,E] projections (no lane-dim slicing of a fused QKV).
    q = (jnp.dot(xb, wq, preferred_element_type=jnp.float32) + bq).reshape(bt, S, E)
    k = (jnp.dot(xb, wk, preferred_element_type=jnp.float32) + bk).reshape(bt, S, E)
    v = (jnp.dot(xb, wv, preferred_element_type=jnp.float32) + bv).reshape(bt, S, E)

    attn = _mha(q, k, v, wo, bo, nhead)                    # [bt*S, E]
    out2 = _layernorm(attn + x2, ln1g, ln1b)
    # Dropout: identity (inference).
    h = jnp.maximum(
        jnp.dot(out2.astype(jnp.bfloat16), w1,
                preferred_element_type=jnp.float32) + b1, 0.0)
    out3 = jnp.dot(h.astype(jnp.bfloat16), w2,
                   preferred_element_type=jnp.float32) + b2
    y = _layernorm(out3 + out2, ln2g, ln2b)
    # Dropout: identity (inference).
    return y.reshape(bt, S, E)


def _head(last, x, w, nhead):
    """Cross attention (last time step vs. encoder output) + MLP head."""
    (wq, bq, wk, bk, wv, bv, wo, bo, lng, lnb, w1, b1, w2, b2) = w
    bt, _, E = last.shape
    S = x.shape[1]
    last2 = last.reshape(bt, E)

    q = (jnp.dot(last2.astype(jnp.bfloat16), wq,
                 preferred_element_type=jnp.float32) + bq).reshape(bt, 1, E)
    x2b = x.reshape(bt * S, E).astype(jnp.bfloat16)
    k = (jnp.dot(x2b, wk, preferred_element_type=jnp.float32) + bk).reshape(bt, S, E)
    v = (jnp.dot(x2b, wv, preferred_element_type=jnp.float32) + bv).reshape(bt, S, E)

    attn = _mha(q, k, v, wo, bo, nhead)                    # [bt, E]
    y = _layernorm(attn + last2, lng, lnb)
    # Dropout: identity (inference).
    h = jnp.maximum(
        jnp.dot(y.astype(jnp.bfloat16), w1,
                preferred_element_type=jnp.float32) + b1, 0.0)       # [bt, H]
    # Final [H] -> 1 projection as a VPU mul + lane reduce (avoids a
    # degenerate N=1 MXU matmul).
    return jnp.sum(h * w2, axis=-1, keepdims=True) + b2              # [bt, 1]


# ----------------------------------------------------------------------------
# Fused kernel body: grid = (batch_tiles, num_layers)
# ----------------------------------------------------------------------------
_LAYER_KEYS = ("wq", "bq", "wk", "bk", "wv", "bv", "wo", "bo",
               "ln1g", "ln1b", "w1", "b1", "w2", "b2", "ln2g", "ln2b")
_HEAD_KEYS = ("wq", "bq", "wk", "bk", "wv", "bv", "wo", "bo",
              "lng", "lnb", "w1", "b1", "w2", "b2")
_NLW = len(_LAYER_KEYS)
_NHW = len(_HEAD_KEYS)


def _transformer_kernel(nhead, *refs):
    x_ref, pe_ref = refs[0], refs[1]
    lrefs = refs[2:2 + _NLW]
    hrefs = refs[2 + _NLW:2 + _NLW + _NHW]
    n_in = 2 + _NLW + _NHW
    o_ref = refs[n_in]
    x_act = refs[n_in + 1]
    last_act = refs[n_in + 2]

    layer = pl.program_id(1)
    S = x_act.shape[1]

    # First layer step of this batch tile: add PE and stash the (post-PE,
    # pre-encoder) last time step for the cross-attention head.
    @pl.when(layer == 0)
    def _():
        xin = x_ref[...] + pe_ref[...][None, :, :]
        x_act[...] = xin
        last_act[...] = xin[:, S - 1:S, :]

    lw = [r[...] for r in lrefs]                # this layer's weights (bf16/f32)
    y = _encoder_layer(x_act[...], lw, nhead)   # [bt, S, E]
    x_act[...] = y

    # Last layer step: cross attention + layernorm + MLP head, written as one
    # [bt, 1, 1] output slab.
    @pl.when(layer == pl.num_programs(1) - 1)
    def _():
        hw = [r[...] for r in hrefs]
        res = _head(last_act[...], y, hw, nhead)            # [bt, 1]
        o_ref[...] = res.reshape(res.shape[0], 1, 1)


# ----------------------------------------------------------------------------
# Wrapper
# ----------------------------------------------------------------------------
def position_encoding_sinusoid(seq_len, d_model):
    pos = jnp.arange(seq_len, dtype=jnp.float32)[:, None]
    div = jnp.exp(jnp.arange(0, d_model, 2, dtype=jnp.float32)
                  * (-math.log(10000.0) / d_model))
    pe = jnp.zeros((seq_len, d_model), dtype=jnp.float32)
    pe = pe.at[:, 0::2].set(jnp.sin(pos * div))
    pe = pe.at[:, 1::2].set(jnp.cos(pos * div))
    return pe


def _stacked_spec(shape):
    """BlockSpec for a [num_layers, ...] stacked weight: layer dim squeezed,
    indexed by the layer grid axis (double-buffered across layers)."""
    rest = tuple(int(d) for d in shape[1:])
    n = len(rest)
    return pl.BlockSpec((None,) + rest, lambda b, l, _n=n: (l,) + (0,) * _n)


def _const_spec(shape):
    """BlockSpec for a weight loaded once and kept resident (head weights)."""
    s = tuple(int(d) for d in shape)
    n = len(s)
    return pl.BlockSpec(s, lambda b, l, _n=n: (0,) * _n)


def transformer_forward(x, kparams, nhead, *, batch_tile=None):
    """x: [B, S, E] f32; kparams from prepare_kernel_params."""
    B, S, E = x.shape
    pe = position_encoding_sinusoid(S, E)
    enc, head = kparams["encoder"], kparams["head"]
    num_layers = int(enc["wq"].shape[0])

    if batch_tile is None:
        # Split the batch into two tiles when possible so the 'parallel' grid
        # axis can be sharded across both v7x TensorCores (no cost on
        # single-core v5e/v6e); otherwise use one tile.
        batch_tile = B // 2 if (B >= 2 and B % 2 == 0) else B
    n_bt = B // batch_tile
    assert n_bt * batch_tile == B, "batch_tile must divide B"

    enc_args = [enc[kk] for kk in _LAYER_KEYS]
    head_args = [head[kk] for kk in _HEAD_KEYS]
    args = [x, pe] + enc_args + head_args

    in_specs = (
        [pl.BlockSpec((batch_tile, S, E), lambda b, l: (b, 0, 0)),
         pl.BlockSpec((S, E), lambda b, l: (0, 0))]
        + [_stacked_spec(a.shape) for a in enc_args]
        + [_const_spec(a.shape) for a in head_args]
    )
    out_spec = pl.BlockSpec((batch_tile, 1, 1), lambda b, l: (b, 0, 0))

    # Advisory cost estimate for XLA's scheduler.
    ff = int(enc["w1"].shape[-1])
    hid = int(head["w1"].shape[-1])
    flops = num_layers * B * (2 * S * E * E * 4 + 2 * S * S * E * 2
                              + 2 * S * E * ff * 2)
    flops += B * (2 * E * E * 2 + 2 * 2 * S * E * E + 2 * S * E * 2
                  + 2 * E * hid + 2 * hid)
    transcend = B * nhead * S * (num_layers * S + 1)
    bytes_accessed = sum(int(a.size) * a.dtype.itemsize for a in args) + 4 * B

    out = pl.pallas_call(
        functools.partial(_transformer_kernel, nhead),
        out_shape=jax.ShapeDtypeStruct((B, 1, 1), jnp.float32),
        grid_spec=pltpu.PrefetchScalarGridSpec(
            num_scalar_prefetch=0,
            grid=(n_bt, num_layers),
            in_specs=in_specs,
            out_specs=out_spec,
            scratch_shapes=[
                pltpu.VMEM((batch_tile, S, E), jnp.float32),   # activations
                pltpu.VMEM((batch_tile, 1, E), jnp.float32),   # last time step
            ],
        ),
        compiler_params=pltpu.CompilerParams(
            dimension_semantics=("parallel", "arbitrary"),
            # Re-derived for v7x's 64 MiB VMEM: resident set is ~2 layers of
            # (double-buffered) weights + one batch tile of activations.
            vmem_limit_bytes=48 * 1024 * 1024,
        ),
        cost_estimate=pl.CostEstimate(
            flops=int(flops),
            transcendentals=int(transcend),
            bytes_accessed=int(bytes_accessed)),
    )(*args)
    return out.reshape(B, 1)


# ----------------------------------------------------------------------------
# Host-side weight preparation: transpose to [in, out], stack per-layer
# weights over a leading layer axis, fold the attention scale into the Q
# projection, store Wo per head, cast matmul weights to bf16.
# ----------------------------------------------------------------------------
def prepare_kernel_params(params, nhead):
    bf16 = jnp.bfloat16
    enc_layers = params["encoder_layers"]
    E = enc_layers[0]["ow"].shape[0]
    dh = E // nhead
    scale = 1.0 / math.sqrt(dh)

    def stack(fn):
        return jnp.stack([fn(p) for p in enc_layers], axis=0)

    enc = dict(
        # 1/sqrt(dh) folded into the Q projection (weights and bias).
        wq=stack(lambda p: (p["inw"][0:E].T * scale).astype(bf16)),
        bq=stack(lambda p: p["inb"][:, 0:E] * scale),
        wk=stack(lambda p: p["inw"][E:2 * E].T.astype(bf16)),
        bk=stack(lambda p: p["inb"][:, E:2 * E]),
        wv=stack(lambda p: p["inw"][2 * E:3 * E].T.astype(bf16)),
        bv=stack(lambda p: p["inb"][:, 2 * E:3 * E]),
        # Wo stored per head [nhead, dh, E] so the in-kernel output projection
        # is one batched matmul (no lane-dim concat of head outputs).
        wo=stack(lambda p: p["ow"].T.reshape(nhead, dh, E).astype(bf16)),
        bo=stack(lambda p: p["ob"]),
        ln1g=stack(lambda p: p["ln1g"]), ln1b=stack(lambda p: p["ln1b"]),
        w1=stack(lambda p: p["f1w"].T.astype(bf16)),
        b1=stack(lambda p: p["f1b"]),
        w2=stack(lambda p: p["f2w"].T.astype(bf16)),
        b2=stack(lambda p: p["f2b"]),
        ln2g=stack(lambda p: p["ln2g"]), ln2b=stack(lambda p: p["ln2b"]),
    )
    h = params["head"]
    head = dict(
        wq=(h["inw"][0:E].T * scale).astype(bf16),
        bq=h["inb"][:, 0:E] * scale,
        wk=h["inw"][E:2 * E].T.astype(bf16),
        bk=h["inb"][:, E:2 * E],
        wv=h["inw"][2 * E:3 * E].T.astype(bf16),
        bv=h["inb"][:, 2 * E:3 * E],
        wo=h["ow"].T.reshape(nhead, dh, E).astype(bf16),
        bo=h["ob"],
        lng=h["lng"], lnb=h["lnb"],
        w1=h["w1"].T.astype(bf16), b1=h["b1"],
        w2=h["w2"],                               # [1, H] f32 (lane reduce)
        b2=h["b2"],                               # [1, 1] f32
    )
    return dict(encoder=enc, head=head)


# ----------------------------------------------------------------------------
# Pure-JAX f32 reference (PyTorch-layout weights) for the correctness check
# ----------------------------------------------------------------------------
def _ref_mha(q_in, kv_in, inw, inb, ow, ob, nhead):
    E = q_in.shape[-1]
    dh = E // nhead
    scale = 1.0 / math.sqrt(dh)
    q = q_in @ inw[0:E].T + inb[:, 0:E]
    k = kv_in @ inw[E:2 * E].T + inb[:, E:2 * E]
    v = kv_in @ inw[2 * E:3 * E].T + inb[:, 2 * E:3 * E]
    heads = []
    for h in range(nhead):
        sl = slice(h * dh, (h + 1) * dh)
        s = q[:, sl] @ k[:, sl].T * scale
        s = s - jnp.max(s, axis=-1, keepdims=True)
        p = jnp.exp(s)
        p = p / jnp.sum(p, axis=-1, keepdims=True)
        heads.append(p @ v[:, sl])
    o = jnp.concatenate(heads, axis=-1)
    return o @ ow.T + ob


def _ref_forward(x, params, nhead):
    B, S, E = x.shape
    x = x + position_encoding_sinusoid(S, E)[None]
    last = x[:, -1:, :]
    for p in params["encoder_layers"]:
        outs = []
        for b in range(B):
            xb = x[b]
            a = _ref_mha(xb, xb, p["inw"], p["inb"], p["ow"], p["ob"], nhead)
            o2 = _layernorm(a + xb, p["ln1g"], p["ln1b"])
            h = jnp.maximum(o2 @ p["f1w"].T + p["f1b"], 0.0)
            o3 = h @ p["f2w"].T + p["f2b"]
            outs.append(_layernorm(o3 + o2, p["ln2g"], p["ln2b"]))
        x = jnp.stack(outs)
    p = params["head"]
    res = []
    for b in range(B):
        a = _ref_mha(last[b], x[b], p["inw"], p["inb"], p["ow"], p["ob"], nhead)
        y = _layernorm(a + last[b], p["lng"], p["lnb"])
        h = jnp.maximum(y @ p["w1"].T + p["b1"], 0.0)
        res.append(h @ p["w2"].T + p["b2"])
    return jnp.concatenate(res, axis=0)


# ----------------------------------------------------------------------------
# Deterministic parameter init (PyTorch-style layouts, f32)
# ----------------------------------------------------------------------------
def init_params(key, emb_dim, dim_feedforward, hidden_dim, num_layers):
    E, FF, H = emb_dim, dim_feedforward, hidden_dim

    def w(key, shape, scale=0.05):
        return scale * jax.random.normal(key, shape, dtype=jnp.float32)

    layers = []
    for i in range(num_layers):
        ks = jax.random.split(jax.random.fold_in(key, i), 8)
        layers.append(dict(
            inw=w(ks[0], (3 * E, E)), inb=w(ks[1], (1, 3 * E)),
            ow=w(ks[2], (E, E)), ob=w(ks[3], (1, E)),
            ln1g=jnp.ones((1, E), jnp.float32), ln1b=jnp.zeros((1, E), jnp.float32),
            f1w=w(ks[4], (FF, E)), f1b=w(ks[5], (1, FF)),
            f2w=w(ks[6], (E, FF)), f2b=w(ks[7], (1, E)),
            ln2g=jnp.ones((1, E), jnp.float32), ln2b=jnp.zeros((1, E), jnp.float32),
        ))
    kh = jax.random.split(jax.random.fold_in(key, 1000), 8)
    head = dict(
        inw=w(kh[0], (3 * E, E)), inb=w(kh[1], (1, 3 * E)),
        ow=w(kh[2], (E, E)), ob=w(kh[3], (1, E)),
        lng=jnp.ones((1, E), jnp.float32), lnb=jnp.zeros((1, E), jnp.float32),
        w1=w(kh[4], (H, E)), b1=w(kh[5], (1, H)),
        w2=w(kh[6], (1, H)), b2=w(kh[7], (1, 1)),
    )
    return dict(encoder_layers=layers, head=head)


if __name__ == "__main__":
    # Small, module-consistent shapes.
    B, SEQ_LEN, EMB_DIM = 2, 8, 32
    NHEAD, DIM_FF, HIDDEN, NUM_LAYERS = 4, 64, 32, 2

    key = jax.random.PRNGKey(0)
    kx, kp = jax.random.split(key)
    x = jax.random.normal(kx, (B, SEQ_LEN, EMB_DIM), dtype=jnp.float32)
    params = init_params(kp, EMB_DIM, DIM_FF, HIDDEN, NUM_LAYERS)
    kparams = prepare_kernel_params(params, NHEAD)

    out = jax.block_until_ready(transformer_forward(x, kparams, NHEAD))
    assert out.shape == (B, 1), out.shape

    ref = jax.block_until_ready(_ref_forward(x, params, NHEAD))
    # Relaxed tolerance: kernel feeds the MXU bf16 operands (f32 accumulation)
    # and uses an approximate reciprocal for the softmax denominator; the
    # reference is pure f32.
    assert jnp.allclose(out, ref, rtol=2e-2, atol=2e-2), (out, ref)

    print("KERNEL_OK")
</pallas_src>

<mosaic_0001>
module attributes {stable_mosaic.version = 11 : i64} {
  func.func @_transformer_kernel(%arg0: i32, %arg1: i32, %arg2: memref<1x8x32xf32, #tpu.memory_space<vmem>>, %arg3: memref<8x32xf32, #tpu.memory_space<vmem>>, %arg4: memref<1x32x32xbf16, #tpu.memory_space<vmem>>, %arg5: memref<1x1x32xf32, #tpu.memory_space<vmem>>, %arg6: memref<1x32x32xbf16, #tpu.memory_space<vmem>>, %arg7: memref<1x1x32xf32, #tpu.memory_space<vmem>>, %arg8: memref<1x32x32xbf16, #tpu.memory_space<vmem>>, %arg9: memref<1x1x32xf32, #tpu.memory_space<vmem>>, %arg10: memref<1x4x8x32xbf16, #tpu.memory_space<vmem>>, %arg11: memref<1x1x32xf32, #tpu.memory_space<vmem>>, %arg12: memref<1x1x32xf32, #tpu.memory_space<vmem>>, %arg13: memref<1x1x32xf32, #tpu.memory_space<vmem>>, %arg14: memref<1x32x64xbf16, #tpu.memory_space<vmem>>, %arg15: memref<1x1x64xf32, #tpu.memory_space<vmem>>, %arg16: memref<1x64x32xbf16, #tpu.memory_space<vmem>>, %arg17: memref<1x1x32xf32, #tpu.memory_space<vmem>>, %arg18: memref<1x1x32xf32, #tpu.memory_space<vmem>>, %arg19: memref<1x1x32xf32, #tpu.memory_space<vmem>>, %arg20: memref<32x32xbf16, #tpu.memory_space<vmem>>, %arg21: memref<1x32xf32, #tpu.memory_space<vmem>>, %arg22: memref<32x32xbf16, #tpu.memory_space<vmem>>, %arg23: memref<1x32xf32, #tpu.memory_space<vmem>>, %arg24: memref<32x32xbf16, #tpu.memory_space<vmem>>, %arg25: memref<1x32xf32, #tpu.memory_space<vmem>>, %arg26: memref<4x8x32xbf16, #tpu.memory_space<vmem>>, %arg27: memref<1x32xf32, #tpu.memory_space<vmem>>, %arg28: memref<1x32xf32, #tpu.memory_space<vmem>>, %arg29: memref<1x32xf32, #tpu.memory_space<vmem>>, %arg30: memref<32x32xbf16, #tpu.memory_space<vmem>>, %arg31: memref<1x32xf32, #tpu.memory_space<vmem>>, %arg32: memref<1x32xf32, #tpu.memory_space<vmem>>, %arg33: memref<1x1xf32, #tpu.memory_space<vmem>>, %arg34: memref<1x1x1xf32, #tpu.memory_space<vmem>>, %arg35: memref<1x8x32xf32, #tpu.memory_space<vmem>>, %arg36: memref<1x1x32xf32, #tpu.memory_space<vmem>>) attributes {dimension_semantics = [#tpu.dimension_semantics<parallel>, #tpu.dimension_semantics<arbitrary>], iteration_bounds = array<i64: 2, 2>, scalar_prefetch = 0 : i64, scratch_operands = 2 : i64, tpu.core_type = #tpu.core_type<tc>, window_params = [{transform_indices = @transform_0, window_bounds = array<i64: 1, 8, 32>}, {pipeline_mode = #tpu.pipeline_mode<synchronous>, transform_indices = @transform_1, window_bounds = array<i64: 8, 32>}, {transform_indices = @transform_2, window_bounds = array<i64: 1, 32, 32>}, {transform_indices = @transform_3, window_bounds = array<i64: 1, 1, 32>}, {transform_indices = @transform_4, window_bounds = array<i64: 1, 32, 32>}, {transform_indices = @transform_5, window_bounds = array<i64: 1, 1, 32>}, {transform_indices = @transform_6, window_bounds = array<i64: 1, 32, 32>}, {transform_indices = @transform_7, window_bounds = array<i64: 1, 1, 32>}, {transform_indices = @transform_8, window_bounds = array<i64: 1, 4, 8, 32>}, {transform_indices = @transform_9, window_bounds = array<i64: 1, 1, 32>}, {transform_indices = @transform_10, window_bounds = array<i64: 1, 1, 32>}, {transform_indices = @transform_11, window_bounds = array<i64: 1, 1, 32>}, {transform_indices = @transform_12, window_bounds = array<i64: 1, 32, 64>}, {transform_indices = @transform_13, window_bounds = array<i64: 1, 1, 64>}, {transform_indices = @transform_14, window_bounds = array<i64: 1, 64, 32>}, {transform_indices = @transform_15, window_bounds = array<i64: 1, 1, 32>}, {transform_indices = @transform_16, window_bounds = array<i64: 1, 1, 32>}, {transform_indices = @transform_17, window_bounds = array<i64: 1, 1, 32>}, {pipeline_mode = #tpu.pipeline_mode<synchronous>, transform_indices = @transform_18, window_bounds = array<i64: 32, 32>}, {pipeline_mode = #tpu.pipeline_mode<synchronous>, transform_indices = @transform_19, window_bounds = array<i64: 1, 32>}, {pipeline_mode = #tpu.pipeline_mode<synchronous>, transform_indices = @transform_20, window_bounds = array<i64: 32, 32>}, {pipeline_mode = #tpu.pipeline_mode<synchronous>, transform_indices = @transform_21, window_bounds = array<i64: 1, 32>}, {pipeline_mode = #tpu.pipeline_mode<synchronous>, transform_indices = @transform_22, window_bounds = array<i64: 32, 32>}, {pipeline_mode = #tpu.pipeline_mode<synchronous>, transform_indices = @transform_23, window_bounds = array<i64: 1, 32>}, {pipeline_mode = #tpu.pipeline_mode<synchronous>, transform_indices = @transform_24, window_bounds = array<i64: 4, 8, 32>}, {pipeline_mode = #tpu.pipeline_mode<synchronous>, transform_indices = @transform_25, window_bounds = array<i64: 1, 32>}, {pipeline_mode = #tpu.pipeline_mode<synchronous>, transform_indices = @transform_26, window_bounds = array<i64: 1, 32>}, {pipeline_mode = #tpu.pipeline_mode<synchronous>, transform_indices = @transform_27, window_bounds = array<i64: 1, 32>}, {pipeline_mode = #tpu.pipeline_mode<synchronous>, transform_indices = @transform_28, window_bounds = array<i64: 32, 32>}, {pipeline_mode = #tpu.pipeline_mode<synchronous>, transform_indices = @transform_29, window_bounds = array<i64: 1, 32>}, {pipeline_mode = #tpu.pipeline_mode<synchronous>, transform_indices = @transform_30, window_bounds = array<i64: 1, 32>}, {pipeline_mode = #tpu.pipeline_mode<synchronous>, transform_indices = @transform_31, window_bounds = array<i64: 1, 1>}, {transform_indices = @transform_32, window_bounds = array<i64: 1, 1, 1>}]} {
    %c0_i32 = arith.constant 0 : i32
    %0 = arith.cmpi eq, %arg1, %c0_i32 : i32
    %1 = arith.extui %0 : i1 to i32
    %c0_i32_0 = arith.constant 0 : i32
    %2 = arith.cmpi ne, %1, %c0_i32_0 : i32
    scf.if %2 {
      %c0_77 = arith.constant 0 : index
      %c0_78 = arith.constant 0 : index
      %c0_79 = arith.constant 0 : index
      %147 = vector.load %arg2[%c0_77, %c0_78, %c0_79] : memref<1x8x32xf32, #tpu.memory_space<vmem>>, vector<1x8x32xf32>
      %c0_80 = arith.constant 0 : index
      %c0_81 = arith.constant 0 : index
      %148 = vector.load %arg3[%c0_80, %c0_81] : memref<8x32xf32, #tpu.memory_space<vmem>>, vector<8x32xf32>
      %149 = vector.shape_cast %148 : vector<8x32xf32> to vector<1x8x32xf32>
      %150 = arith.addf %147, %149 : vector<1x8x32xf32>
      %c0_82 = arith.constant 0 : index
      %c0_83 = arith.constant 0 : index
      %c0_84 = arith.constant 0 : index
      %151 = vector.load %arg35[%c0_82, %c0_83, %c0_84] : memref<1x8x32xf32, #tpu.memory_space<vmem>>, vector<1x8x32xf32>
      tpu.vector_store %arg35[%c0_82, %c0_83, %c0_84], %150 {strides = array<i32>} : memref<1x8x32xf32, #tpu.memory_space<vmem>>, vector<1x8x32xf32>,
      %152 = vector.extract_strided_slice %150 {offsets = [0, 7, 0], sizes = [1, 1, 32], strides = [1, 1, 1]} : vector<1x8x32xf32> to vector<1x1x32xf32>
      %c0_85 = arith.constant 0 : index
      %c0_86 = arith.constant 0 : index
      %c0_87 = arith.constant 0 : index
      %153 = vector.load %arg36[%c0_85, %c0_86, %c0_87] : memref<1x1x32xf32, #tpu.memory_space<vmem>>, vector<1x1x32xf32>
      tpu.vector_store %arg36[%c0_85, %c0_86, %c0_87], %152 {strides = array<i32>} : memref<1x1x32xf32, #tpu.memory_space<vmem>>, vector<1x1x32xf32>,
    } else {
    }
    %c0 = arith.constant 0 : index
    %c0_1 = arith.constant 0 : index
    %c0_2 = arith.constant 0 : index
    %3 = vector.load %arg4[%c0, %c0_1, %c0_2] : memref<1x32x32xbf16, #tpu.memory_space<vmem>>, vector<1x32x32xbf16>
    %4 = vector.shape_cast %3 : vector<1x32x32xbf16> to vector<32x32xbf16>
    %c0_3 = arith.constant 0 : index
    %c0_4 = arith.constant 0 : index
    %c0_5 = arith.constant 0 : index
    %5 = vector.load %arg5[%c0_3, %c0_4, %c0_5] : memref<1x1x32xf32, #tpu.memory_space<vmem>>, vector<1x1x32xf32>
    %6 = vector.shape_cast %5 : vector<1x1x32xf32> to vector<1x32xf32>
    %c0_6 = arith.constant 0 : index
    %c0_7 = arith.constant 0 : index
    %c0_8 = arith.constant 0 : index
    %7 = vector.load %arg6[%c0_6, %c0_7, %c0_8] : memref<1x32x32xbf16, #tpu.memory_space<vmem>>, vector<1x32x32xbf16>
    %8 = vector.shape_cast %7 : vector<1x32x32xbf16> to vector<32x32xbf16>
    %c0_9 = arith.constant 0 : index
    %c0_10 = arith.constant 0 : index
    %c0_11 = arith.constant 0 : index
    %9 = vector.load %arg7[%c0_9, %c0_10, %c0_11] : memref<1x1x32xf32, #tpu.memory_space<vmem>>, vector<1x1x32xf32>
    %10 = vector.shape_cast %9 : vector<1x1x32xf32> to vector<1x32xf32>
    %c0_12 = arith.constant 0 : index
    %c0_13 = arith.constant 0 : index
    %c0_14 = arith.constant 0 : index
    %11 = vector.load %arg8[%c0_12, %c0_13, %c0_14] : memref<1x32x32xbf16, #tpu.memory_space<vmem>>, vector<1x32x32xbf16>
    %12 = vector.shape_cast %11 : vector<1x32x32xbf16> to vector<32x32xbf16>
    %c0_15 = arith.constant 0 : index
    %c0_16 = arith.constant 0 : index
    %c0_17 = arith.constant 0 : index
    %13 = vector.load %arg9[%c0_15, %c0_16, %c0_17] : memref<1x1x32xf32, #tpu.memory_space<vmem>>, vector<1x1x32xf32>
    %14 = vector.shape_cast %13 : vector<1x1x32xf32> to vector<1x32xf32>
    %c0_18 = arith.constant 0 : index
    %c0_19 = arith.constant 0 : index
    %c0_20 = arith.constant 0 : index
    %c0_21 = arith.constant 0 : index
    %15 = vector.load %arg10[%c0_18, %c0_19, %c0_20, %c0_21] : memref<1x4x8x32xbf16, #tpu.memory_space<vmem>>, vector<1x4x8x32xbf16>
    %16 = vector.shape_cast %15 : vector<1x4x8x32xbf16> to vector<4x8x32xbf16>
    %c0_22 = arith.constant 0 : index
    %c0_23 = arith.constant 0 : index
    %c0_24 = arith.constant 0 : index
    %17 = vector.load %arg11[%c0_22, %c0_23, %c0_24] : memref<1x1x32xf32, #tpu.memory_space<vmem>>, vector<1x1x32xf32>
    %18 = vector.shape_cast %17 : vector<1x1x32xf32> to vector<1x32xf32>
    %c0_25 = arith.constant 0 : index
    %c0_26 = arith.constant 0 : index
    %c0_27 = arith.constant 0 : index
    %19 = vector.load %arg12[%c0_25, %c0_26, %c0_27] : memref<1x1x32xf32, #tpu.memory_space<vmem>>, vector<1x1x32xf32>
    %20 = vector.shape_cast %19 : vector<1x1x32xf32> to vector<1x32xf32>
    %c0_28 = arith.constant 0 : index
    %c0_29 = arith.constant 0 : index
    %c0_30 = arith.constant 0 : index
    %21 = vector.load %arg13[%c0_28, %c0_29, %c0_30] : memref<1x1x32xf32, #tpu.memory_space<vmem>>, vector<1x1x32xf32>
    %22 = vector.shape_cast %21 : vector<1x1x32xf32> to vector<1x32xf32>
    %c0_31 = arith.constant 0 : index
    %c0_32 = arith.constant 0 : index
    %c0_33 = arith.constant 0 : index
    %23 = vector.load %arg14[%c0_31, %c0_32, %c0_33] : memref<1x32x64xbf16, #tpu.memory_space<vmem>>, vector<1x32x64xbf16>
    %24 = vector.shape_cast %23 : vector<1x32x64xbf16> to vector<32x64xbf16>
    %c0_34 = arith.constant 0 : index
    %c0_35 = arith.constant 0 : index
    %c0_36 = arith.constant 0 : index
    %25 = vector.load %arg15[%c0_34, %c0_35, %c0_36] : memref<1x1x64xf32, #tpu.memory_space<vmem>>, vector<1x1x64xf32>
    %26 = vector.shape_cast %25 : vector<1x1x64xf32> to vector<1x64xf32>
    %c0_37 = arith.constant 0 : index
    %c0_38 = arith.constant 0 : index
    %c0_39 = arith.constant 0 : index
    %27 = vector.load %arg16[%c0_37, %c0_38, %c0_39] : memref<1x64x32xbf16, #tpu.memory_space<vmem>>, vector<1x64x32xbf16>
    %28 = vector.shape_cast %27 : vector<1x64x32xbf16> to vector<64x32xbf16>
    %c0_40 = arith.constant 0 : index
    %c0_41 = arith.constant 0 : index
    %c0_42 = arith.constant 0 : index
    %29 = vector.load %arg17[%c0_40, %c0_41, %c0_42] : memref<1x1x32xf32, #tpu.memory_space<vmem>>, vector<1x1x32xf32>
    %30 = vector.shape_cast %29 : vector<1x1x32xf32> to vector<1x32xf32>
    %c0_43 = arith.constant 0 : index
    %c0_44 = arith.constant 0 : index
    %c0_45 = arith.constant 0 : index
    %31 = vector.load %arg18[%c0_43, %c0_44, %c0_45] : memref<1x1x32xf32, #tpu.memory_space<vmem>>, vector<1x1x32xf32>
    %32 = vector.shape_cast %31 : vector<1x1x32xf32> to vector<1x32xf32>
    %c0_46 = arith.constant 0 : index
    %c0_47 = arith.constant 0 : index
    %c0_48 = arith.constant 0 : index
    %33 = vector.load %arg19[%c0_46, %c0_47, %c0_48] : memref<1x1x32xf32, #tpu.memory_space<vmem>>, vector<1x1x32xf32>
    %34 = vector.shape_cast %33 : vector<1x1x32xf32> to vector<1x32xf32>
    %c0_49 = arith.constant 0 : index
    %c0_50 = arith.constant 0 : index
    %c0_51 = arith.constant 0 : index
    %35 = vector.load %arg35[%c0_49, %c0_50, %c0_51] : memref<1x8x32xf32, #tpu.memory_space<vmem>>, vector<1x8x32xf32>
    %36 = vector.shape_cast %35 : vector<1x8x32xf32> to vector<8x32xf32>
    %37 = arith.truncf %36 : vector<8x32xf32> to vector<8x32xbf16>
    %cst = arith.constant dense<0.000000e+00> : vector<8x32xf32>
    %38 = tpu.matmul %37, %4, %cst {dimension_numbers = #tpu.dot_dimension_numbers<[1], [0], [0], [1], [0, 0, 1, 1], [], []>} : vector<8x32xbf16>, vector<32x32xbf16>, vector<8x32xf32> -> vector<8x32xf32>
    %39 = vector.broadcast %6 : vector<1x32xf32> to vector<8x32xf32>
    %40 = arith.addf %38, %39 : vector<8x32xf32>
    %41 = vector.shape_cast %40 : vector<8x32xf32> to vector<1x8x32xf32>
    %cst_52 = arith.constant dense<0.000000e+00> : vector<8x32xf32>
    %42 = tpu.matmul %37, %8, %cst_52 {dimension_numbers = #tpu.dot_dimension_numbers<[1], [0], [0], [1], [0, 0, 1, 1], [], []>} : vector<8x32xbf16>, vector<32x32xbf16>, vector<8x32xf32> -> vector<8x32xf32>
    %43 = vector.broadcast %10 : vector<1x32xf32> to vector<8x32xf32>
    %44 = arith.addf %42, %43 : vector<8x32xf32>
    %45 = vector.shape_cast %44 : vector<8x32xf32> to vector<1x8x32xf32>
    %cst_53 = arith.constant dense<0.000000e+00> : vector<8x32xf32>
    %46 = tpu.matmul %37, %12, %cst_53 {dimension_numbers = #tpu.dot_dimension_numbers<[1], [0], [0], [1], [0, 0, 1, 1], [], []>} : vector<8x32xbf16>, vector<32x32xbf16>, vector<8x32xf32> -> vector<8x32xf32>
    %47 = vector.broadcast %14 : vector<1x32xf32> to vector<8x32xf32>
    %48 = arith.addf %46, %47 : vector<8x32xf32>
    %49 = vector.shape_cast %48 : vector<8x32xf32> to vector<1x8x32xf32>
    %50 = arith.truncf %41 : vector<1x8x32xf32> to vector<1x8x32xbf16>
    %51 = vector.extract_strided_slice %50 {offsets = [0, 0, 0], sizes = [1, 8, 8], strides = [1, 1, 1]} : vector<1x8x32xbf16> to vector<1x8x8xbf16>
    %52 = vector.extract_strided_slice %50 {offsets = [0, 0, 8], sizes = [1, 8, 8], strides = [1, 1, 1]} : vector<1x8x32xbf16> to vector<1x8x8xbf16>
    %53 = vector.extract_strided_slice %50 {offsets = [0, 0, 16], sizes = [1, 8, 8], strides = [1, 1, 1]} : vector<1x8x32xbf16> to vector<1x8x8xbf16>
    %54 = vector.extract_strided_slice %50 {offsets = [0, 0, 24], sizes = [1, 8, 8], strides = [1, 1, 1]} : vector<1x8x32xbf16> to vector<1x8x8xbf16>
    %55 = tpu.concatenate %51, %52, %53, %54 in 0 : vector<1x8x8xbf16>, vector<1x8x8xbf16>, vector<1x8x8xbf16>, vector<1x8x8xbf16> -> vector<4x8x8xbf16>
    %56 = arith.truncf %45 : vector<1x8x32xf32> to vector<1x8x32xbf16>
    %57 = vector.extract_strided_slice %56 {offsets = [0, 0, 0], sizes = [1, 8, 8], strides = [1, 1, 1]} : vector<1x8x32xbf16> to vector<1x8x8xbf16>
    %58 = vector.extract_strided_slice %56 {offsets = [0, 0, 8], sizes = [1, 8, 8], strides = [1, 1, 1]} : vector<1x8x32xbf16> to vector<1x8x8xbf16>
    %59 = vector.extract_strided_slice %56 {offsets = [0, 0, 16], sizes = [1, 8, 8], strides = [1, 1, 1]} : vector<1x8x32xbf16> to vector<1x8x8xbf16>
    %60 = vector.extract_strided_slice %56 {offsets = [0, 0, 24], sizes = [1, 8, 8], strides = [1, 1, 1]} : vector<1x8x32xbf16> to vector<1x8x8xbf16>
    %61 = tpu.concatenate %57, %58, %59, %60 in 0 : vector<1x8x8xbf16>, vector<1x8x8xbf16>, vector<1x8x8xbf16>, vector<1x8x8xbf16> -> vector<4x8x8xbf16>
    %62 = arith.truncf %49 : vector<1x8x32xf32> to vector<1x8x32xbf16>
    %63 = vector.extract_strided_slice %62 {offsets = [0, 0, 0], sizes = [1, 8, 8], strides = [1, 1, 1]} : vector<1x8x32xbf16> to vector<1x8x8xbf16>
    %64 = vector.extract_strided_slice %62 {offsets = [0, 0, 8], sizes = [1, 8, 8], strides = [1, 1, 1]} : vector<1x8x32xbf16> to vector<1x8x8xbf16>
    %65 = vector.extract_strided_slice %62 {offsets = [0, 0, 16], sizes = [1, 8, 8], strides = [1, 1, 1]} : vector<1x8x32xbf16> to vector<1x8x8xbf16>
    %66 = vector.extract_strided_slice %62 {offsets = [0, 0, 24], sizes = [1, 8, 8], strides = [1, 1, 1]} : vector<1x8x32xbf16> to vector<1x8x8xbf16>
    %67 = tpu.concatenate %63, %64, %65, %66 in 0 : vector<1x8x8xbf16>, vector<1x8x8xbf16>, vector<1x8x8xbf16>, vector<1x8x8xbf16> -> vector<4x8x8xbf16>
    "tpu.trace_start"() <{level = 10 : i32, message = "bqd,bkd->bqk"}> : () -> ()
    %cst_54 = arith.constant dense<0.000000e+00> : vector<4x8x8xf32>
    %68 = tpu.matmul %55, %61, %cst_54 {dimension_numbers = #tpu.dot_dimension_numbers<[2], [2], [1], [1], [0, 0, 0, 1, 1, 1], [0], [0]>} : vector<4x8x8xbf16>, vector<4x8x8xbf16>, vector<4x8x8xf32> -> vector<4x8x8xf32>
    "tpu.trace_stop"() : () -> ()
    %cst_55 = arith.constant dense<0xFF800000> : vector<4x8xf32>
    %69 = vector.multi_reduction <maximumf>, %68, %cst_55 [2] : vector<4x8x8xf32> to vector<4x8xf32>
    %70 = vector.shape_cast %69 : vector<4x8xf32> to vector<4x8x1xf32>
    %71 = vector.broadcast %70 : vector<4x8x1xf32> to vector<4x8x8xf32>
    %72 = arith.subf %68, %71 : vector<4x8x8xf32>
    %73 = math.exp %72 : vector<4x8x8xf32>
    %cst_56 = arith.constant dense<0.000000e+00> : vector<4x8xf32>
    %74 = vector.multi_reduction <add>, %73, %cst_56 [2] : vector<4x8x8xf32> to vector<4x8xf32>
    %75 = vector.shape_cast %74 : vector<4x8xf32> to vector<4x8x1xf32>
    %76 = tpu.reciprocal %75 {approx = true} : vector<4x8x1xf32> -> vector<4x8x1xf32>
    %77 = vector.broadcast %76 : vector<4x8x1xf32> to vector<4x8x8xf32>
    %78 = arith.mulf %73, %77 : vector<4x8x8xf32>
    %79 = arith.truncf %78 : vector<4x8x8xf32> to vector<4x8x8xbf16>
    "tpu.trace_start"() <{level = 10 : i32, message = "bqk,bkd->bqd"}> : () -> ()
    %cst_57 = arith.constant dense<0.000000e+00> : vector<4x8x8xf32>
    %80 = tpu.matmul %79, %67, %cst_57 {dimension_numbers = #tpu.dot_dimension_numbers<[2], [1], [1], [2], [0, 0, 0, 1, 1, 2], [0], [0]>} : vector<4x8x8xbf16>, vector<4x8x8xbf16>, vector<4x8x8xf32> -> vector<4x8x8xf32>
    "tpu.trace_stop"() : () -> ()
    %81 = vector.shape_cast %16 : vector<4x8x32xbf16> to vector<4x1x8x32xbf16>
    %82 = vector.shape_cast %81 : vector<4x1x8x32xbf16> to vector<4x8x32xbf16>
    %83 = arith.truncf %80 : vector<4x8x8xf32> to vector<4x8x8xbf16>
    "tpu.trace_start"() <{level = 10 : i32, message = "bqd,bde->bqe"}> : () -> ()
    %cst_58 = arith.constant dense<0.000000e+00> : vector<4x8x32xf32>
    %84 = tpu.matmul %83, %82, %cst_58 {dimension_numbers = #tpu.dot_dimension_numbers<[2], [1], [1], [2], [0, 0, 0, 1, 1, 2], [0], [0]>} : vector<4x8x8xbf16>, vector<4x8x32xbf16>, vector<4x8x32xf32> -> vector<4x8x32xf32>
    "tpu.trace_stop"() : () -> ()
    %85 = vector.shape_cast %84 : vector<4x8x32xf32> to vector<4x1x8x32xf32>
    %cst_59 = arith.constant dense<0.000000e+00> : vector<1x8x32xf32>
    %86 = vector.multi_reduction <add>, %85, %cst_59 [0] : vector<4x1x8x32xf32> to vector<1x8x32xf32>
    %87 = vector.shape_cast %86 : vector<1x8x32xf32> to vector<8x32xf32>
    %88 = vector.broadcast %18 : vector<1x32xf32> to vector<8x32xf32>
    %89 = arith.addf %87, %88 : vector<8x32xf32>
    %90 = arith.addf %89, %36 : vector<8x32xf32>
    %cst_60 = arith.constant dense<0.000000e+00> : vector<8xf32>
    %91 = vector.multi_reduction <add>, %90, %cst_60 [1] : vector<8x32xf32> to vector<8xf32>
    %92 = vector.shape_cast %91 : vector<8xf32> to vector<8x1xf32>
    %cst_61 = arith.constant 3.200000e+01 : f32
    %93 = vector.broadcast %cst_61 : f32 to vector<8x1xf32>
    %94 = arith.divf %92, %93 : vector<8x1xf32>
    %95 = vector.broadcast %94 : vector<8x1xf32> to vector<8x32xf32>
    %96 = arith.subf %90, %95 : vector<8x32xf32>
    %97 = arith.mulf %96, %96 : vector<8x32xf32>
    %cst_62 = arith.constant dense<0.000000e+00> : vector<8xf32>
    %98 = vector.multi_reduction <add>, %97, %cst_62 [1] : vector<8x32xf32> to vector<8xf32>
    %99 = vector.shape_cast %98 : vector<8xf32> to vector<8x1xf32>
    %cst_63 = arith.constant 3.200000e+01 : f32
    %100 = vector.broadcast %cst_63 : f32 to vector<8x1xf32>
    %101 = arith.divf %99, %100 : vector<8x1xf32>
    %cst_64 = arith.constant 9.99999974E-6 : f32
    %102 = vector.broadcast %cst_64 : f32 to vector<8x1xf32>
    %103 = arith.addf %101, %102 : vector<8x1xf32>
    %104 = math.rsqrt %103 : vector<8x1xf32>
    %105 = vector.broadcast %104 : vector<8x1xf32> to vector<8x32xf32>
    %106 = arith.mulf %96, %105 : vector<8x32xf32>
    %107 = vector.broadcast %20 : vector<1x32xf32> to vector<8x32xf32>
    %108 = arith.mulf %106, %107 : vector<8x32xf32>
    %109 = vector.broadcast %22 : vector<1x32xf32> to vector<8x32xf32>
    %110 = arith.addf %108, %109 : vector<8x32xf32>
    %111 = arith.truncf %110 : vector<8x32xf32> to vector<8x32xbf16>
    %cst_65 = arith.constant dense<0.000000e+00> : vector<8x64xf32>
    %112 = tpu.matmul %111, %24, %cst_65 {dimension_numbers = #tpu.dot_dimension_numbers<[1], [0], [0], [1], [0, 0, 1, 1], [], []>} : vector<8x32xbf16>, vector<32x64xbf16>, vector<8x64xf32> -> vector<8x64xf32>
    %113 = vector.broadcast %26 : vector<1x64xf32> to vector<8x64xf32>
    %114 = arith.addf %112, %113 : vector<8x64xf32>
    %cst_66 = arith.constant 0.000000e+00 : f32
    %115 = vector.broadcast %cst_66 : f32 to vector<8x64xf32>
    %116 = arith.maximumf %114, %115 : vector<8x64xf32>
    %117 = arith.truncf %116 : vector<8x64xf32> to vector<8x64xbf16>
    %cst_67 = arith.constant dense<0.000000e+00> : vector<8x32xf32>
    %118 = tpu.matmul %117, %28, %cst_67 {dimension_numbers = #tpu.dot_dimension_numbers<[1], [0], [0], [1], [0, 0, 1, 1], [], []>} : vector<8x64xbf16>, vector<64x32xbf16>, vector<8x32xf32> -> vector<8x32xf32>
    %119 = vector.broadcast %30 : vector<1x32xf32> to vector<8x32xf32>
    %120 = arith.addf %118, %119 : vector<8x32xf32>
    %121 = arith.addf %120, %110 : vector<8x32xf32>
    %cst_68 = arith.constant dense<0.000000e+00> : vector<8xf32>
    %122 = vector.multi_reduction <add>, %121, %cst_68 [1] : vector<8x32xf32> to vector<8xf32>
    %123 = vector.shape_cast %122 : vector<8xf32> to vector<8x1xf32>
    %cst_69 = arith.constant 3.200000e+01 : f32
    %124 = vector.broadcast %cst_69 : f32 to vector<8x1xf32>
    %125 = arith.divf %123, %124 : vector<8x1xf32>
    %126 = vector.broadcast %125 : vector<8x1xf32> to vector<8x32xf32>
    %127 = arith.subf %121, %126 : vector<8x32xf32>
    %128 = arith.mulf %127, %127 : vector<8x32xf32>
    %cst_70 = arith.constant dense<0.000000e+00> : vector<8xf32>
    %129 = vector.multi_reduction <add>, %128, %cst_70 [1] : vector<8x32xf32> to vector<8xf32>
    %130 = vector.shape_cast %129 : vector<8xf32> to vector<8x1xf32>
    %cst_71 = arith.constant 3.200000e+01 : f32
    %131 = vector.broadcast %cst_71 : f32 to vector<8x1xf32>
    %132 = arith.divf %130, %131 : vector<8x1xf32>
    %cst_72 = arith.constant 9.99999974E-6 : f32
    %133 = vector.broadcast %cst_72 : f32 to vector<8x1xf32>
    %134 = arith.addf %132, %133 : vector<8x1xf32>
    %135 = math.rsqrt %134 : vector<8x1xf32>
    %136 = vector.broadcast %135 : vector<8x1xf32> to vector<8x32xf32>
    %137 = arith.mulf %127, %136 : vector<8x32xf32>
    %138 = vector.broadcast %32 : vector<1x32xf32> to vector<8x32xf32>
    %139 = arith.mulf %137, %138 : vector<8x32xf32>
    %140 = vector.broadcast %34 : vector<1x32xf32> to vector<8x32xf32>
    %141 = arith.addf %139, %140 : vector<8x32xf32>
    %142 = vector.shape_cast %141 : vector<8x32xf32> to vector<1x8x32xf32>
    %c0_73 = arith.constant 0 : index
    %c0_74 = arith.constant 0 : index
    %c0_75 = arith.constant 0 : index
    %143 = vector.load %arg35[%c0_73, %c0_74, %c0_75] : memref<1x8x32xf32, #tpu.memory_space<vmem>>, vector<1x8x32xf32>
    tpu.vector_store %arg35[%c0_73, %c0_74, %c0_75], %142 {strides = array<i32>} : memref<1x8x32xf32, #tpu.memory_space<vmem>>, vector<1x8x32xf32>,
    %c1_i32 = arith.constant 1 : i32
    %144 = arith.cmpi eq, %arg1, %c1_i32 : i32
    %145 = arith.extui %144 : i1 to i32
    %c0_i32_76 = arith.constant 0 : i32
    %146 = arith.cmpi ne, %145, %c0_i32_76 : i32
    scf.if %146 {
      %c0_77 = arith.constant 0 : index
      %c0_78 = arith.constant 0 : index
      %147 = vector.load %arg20[%c0_77, %c0_78] : memref<32x32xbf16, #tpu.memory_space<vmem>>, vector<32x32xbf16>
      %c0_79 = arith.constant 0 : index
      %c0_80 = arith.constant 0 : index
      %148 = vector.load %arg21[%c0_79, %c0_80] : memref<1x32xf32, #tpu.memory_space<vmem>>, vector<1x32xf32>
      %c0_81 = arith.constant 0 : index
      %c0_82 = arith.constant 0 : index
      %149 = vector.load %arg22[%c0_81, %c0_82] : memref<32x32xbf16, #tpu.memory_space<vmem>>, vector<32x32xbf16>
      %c0_83 = arith.constant 0 : index
      %c0_84 = arith.constant 0 : index
      %150 = vector.load %arg23[%c0_83, %c0_84] : memref<1x32xf32, #tpu.memory_space<vmem>>, vector<1x32xf32>
      %c0_85 = arith.constant 0 : index
      %c0_86 = arith.constant 0 : index
      %151 = vector.load %arg24[%c0_85, %c0_86] : memref<32x32xbf16, #tpu.memory_space<vmem>>, vector<32x32xbf16>
      %c0_87 = arith.constant 0 : index
      %c0_88 = arith.constant 0 : index
      %152 = vector.load %arg25[%c0_87, %c0_88] : memref<1x32xf32, #tpu.memory_space<vmem>>, vector<1x32xf32>
      %c0_89 = arith.constant 0 : index
      %c0_90 = arith.constant 0 : index
      %c0_91 = arith.constant 0 : index
      %153 = vector.load %arg26[%c0_89, %c0_90, %c0_91] : memref<4x8x32xbf16, #tpu.memory_space<vmem>>, vector<4x8x32xbf16>
      %c0_92 = arith.constant 0 : index
      %c0_93 = arith.constant 0 : index
      %154 = vector.load %arg27[%c0_92, %c0_93] : memref<1x32xf32, #tpu.memory_space<vmem>>, vector<1x32xf32>
      %c0_94 = arith.constant 0 : index
      %c0_95 = arith.constant 0 : index
      %155 = vector.load %arg28[%c0_94, %c0_95] : memref<1x32xf32, #tpu.memory_space<vmem>>, vector<1x32xf32>
      %c0_96 = arith.constant 0 : index
      %c0_97 = arith.constant 0 : index
      %156 = vector.load %arg29[%c0_96, %c0_97] : memref<1x32xf32, #tpu.memory_space<vmem>>, vector<1x32xf32>
      %c0_98 = arith.constant 0 : index
      %c0_99 = arith.constant 0 : index
      %157 = vector.load %arg30[%c0_98, %c0_99] : memref<32x32xbf16, #tpu.memory_space<vmem>>, vector<32x32xbf16>
      %c0_100 = arith.constant 0 : index
      %c0_101 = arith.constant 0 : index
      %158 = vector.load %arg31[%c0_100, %c0_101] : memref<1x32xf32, #tpu.memory_space<vmem>>, vector<1x32xf32>
      %c0_102 = arith.constant 0 : index
      %c0_103 = arith.constant 0 : index
      %159 = vector.load %arg32[%c0_102, %c0_103] : memref<1x32xf32, #tpu.memory_space<vmem>>, vector<1x32xf32>
      %c0_104 = arith.constant 0 : index
      %c0_105 = arith.constant 0 : index
      %160 = vector.load %arg33[%c0_104, %c0_105] : memref<1x1xf32, #tpu.memory_space<vmem>>, vector<1x1xf32>
      %c0_106 = arith.constant 0 : index
      %c0_107 = arith.constant 0 : index
      %c0_108 = arith.constant 0 : index
      %161 = vector.load %arg36[%c0_106, %c0_107, %c0_108] : memref<1x1x32xf32, #tpu.memory_space<vmem>>, vector<1x1x32xf32>
      %162 = vector.shape_cast %161 : vector<1x1x32xf32> to vector<1x32xf32>
      %163 = arith.truncf %162 : vector<1x32xf32> to vector<1x32xbf16>
      %cst_109 = arith.constant dense<0.000000e+00> : vector<1x32xf32>
      %164 = tpu.matmul %163, %147, %cst_109 {dimension_numbers = #tpu.dot_dimension_numbers<[1], [0], [0], [1], [0, 0, 1, 1], [], []>} : vector<1x32xbf16>, vector<32x32xbf16>, vector<1x32xf32> -> vector<1x32xf32>
      %165 = arith.addf %164, %148 : vector<1x32xf32>
      %166 = vector.shape_cast %165 : vector<1x32xf32> to vector<1x1x32xf32>
      %167 = vector.shape_cast %142 : vector<1x8x32xf32> to vector<8x32xf32>
      %168 = arith.truncf %167 : vector<8x32xf32> to vector<8x32xbf16>
      %cst_110 = arith.constant dense<0.000000e+00> : vector<8x32xf32>
      %169 = tpu.matmul %168, %149, %cst_110 {dimension_numbers = #tpu.dot_dimension_numbers<[1], [0], [0], [1], [0, 0, 1, 1], [], []>} : vector<8x32xbf16>, vector<32x32xbf16>, vector<8x32xf32> -> vector<8x32xf32>
      %170 = vector.broadcast %150 : vector<1x32xf32> to vector<8x32xf32>
      %171 = arith.addf %169, %170 : vector<8x32xf32>
      %172 = vector.shape_cast %171 : vector<8x32xf32> to vector<1x8x32xf32>
      %cst_111 = arith.constant dense<0.000000e+00> : vector<8x32xf32>
      %173 = tpu.matmul %168, %151, %cst_111 {dimension_numbers = #tpu.dot_dimension_numbers<[1], [0], [0], [1], [0, 0, 1, 1], [], []>} : vector<8x32xbf16>, vector<32x32xbf16>, vector<8x32xf32> -> vector<8x32xf32>
      %174 = vector.broadcast %152 : vector<1x32xf32> to vector<8x32xf32>
      %175 = arith.addf %173, %174 : vector<8x32xf32>
      %176 = vector.shape_cast %175 : vector<8x32xf32> to vector<1x8x32xf32>
      %177 = arith.truncf %166 : vector<1x1x32xf32> to vector<1x1x32xbf16>
      %178 = vector.extract_strided_slice %177 {offsets = [0, 0, 0], sizes = [1, 1, 8], strides = [1, 1, 1]} : vector<1x1x32xbf16> to vector<1x1x8xbf16>
      %179 = vector.extract_strided_slice %177 {offsets = [0, 0, 8], sizes = [1, 1, 8], strides = [1, 1, 1]} : vector<1x1x32xbf16> to vector<1x1x8xbf16>
      %180 = vector.extract_strided_slice %177 {offsets = [0, 0, 16], sizes = [1, 1, 8], strides = [1, 1, 1]} : vector<1x1x32xbf16> to vector<1x1x8xbf16>
      %181 = vector.extract_strided_slice %177 {offsets = [0, 0, 24], sizes = [1, 1, 8], strides = [1, 1, 1]} : vector<1x1x32xbf16> to vector<1x1x8xbf16>
      %182 = tpu.concatenate %178, %179, %180, %181 in 0 : vector<1x1x8xbf16>, vector<1x1x8xbf16>, vector<1x1x8xbf16>, vector<1x1x8xbf16> -> vector<4x1x8xbf16>
      %183 = arith.truncf %172 : vector<1x8x32xf32> to vector<1x8x32xbf16>
      %184 = vector.extract_strided_slice %183 {offsets = [0, 0, 0], sizes = [1, 8, 8], strides = [1, 1, 1]} : vector<1x8x32xbf16> to vector<1x8x8xbf16>
      %185 = vector.extract_strided_slice %183 {offsets = [0, 0, 8], sizes = [1, 8, 8], strides = [1, 1, 1]} : vector<1x8x32xbf16> to vector<1x8x8xbf16>
      %186 = vector.extract_strided_slice %183 {offsets = [0, 0, 16], sizes = [1, 8, 8], strides = [1, 1, 1]} : vector<1x8x32xbf16> to vector<1x8x8xbf16>
      %187 = vector.extract_strided_slice %183 {offsets = [0, 0, 24], sizes = [1, 8, 8], strides = [1, 1, 1]} : vector<1x8x32xbf16> to vector<1x8x8xbf16>
      %188 = tpu.concatenate %184, %185, %186, %187 in 0 : vector<1x8x8xbf16>, vector<1x8x8xbf16>, vector<1x8x8xbf16>, vector<1x8x8xbf16> -> vector<4x8x8xbf16>
      %189 = arith.truncf %176 : vector<1x8x32xf32> to vector<1x8x32xbf16>
      %190 = vector.extract_strided_slice %189 {offsets = [0, 0, 0], sizes = [1, 8, 8], strides = [1, 1, 1]} : vector<1x8x32xbf16> to vector<1x8x8xbf16>
      %191 = vector.extract_strided_slice %189 {offsets = [0, 0, 8], sizes = [1, 8, 8], strides = [1, 1, 1]} : vector<1x8x32xbf16> to vector<1x8x8xbf16>
      %192 = vector.extract_strided_slice %189 {offsets = [0, 0, 16], sizes = [1, 8, 8], strides = [1, 1, 1]} : vector<1x8x32xbf16> to vector<1x8x8xbf16>
      %193 = vector.extract_strided_slice %189 {offsets = [0, 0, 24], sizes = [1, 8, 8], strides = [1, 1, 1]} : vector<1x8x32xbf16> to vector<1x8x8xbf16>
      %194 = tpu.concatenate %190, %191, %192, %193 in 0 : vector<1x8x8xbf16>, vector<1x8x8xbf16>, vector<1x8x8xbf16>, vector<1x8x8xbf16> -> vector<4x8x8xbf16>
      "tpu.trace_start"() <{level = 10 : i32, message = "bqd,bkd->bqk"}> : () -> ()
      %cst_112 = arith.constant dense<0.000000e+00> : vector<4x1x8xf32>
      %195 = tpu.matmul %182, %188, %cst_112 {dimension_numbers = #tpu.dot_dimension_numbers<[2], [2], [1], [1], [0, 0, 0, 1, 1, 1], [0], [0]>} : vector<4x1x8xbf16>, vector<4x8x8xbf16>, vector<4x1x8xf32> -> vector<4x1x8xf32>
      "tpu.trace_stop"() : () -> ()
      %cst_113 = arith.constant dense<0xFF800000> : vector<4x1xf32>
      %196 = vector.multi_reduction <maximumf>, %195, %cst_113 [2] : vector<4x1x8xf32> to vector<4x1xf32>
      %197 = vector.shape_cast %196 : vector<4x1xf32> to vector<4x1x1xf32>
      %198 = vector.broadcast %197 : vector<4x1x1xf32> to vector<4x1x8xf32>
      %199 = arith.subf %195, %198 : vector<4x1x8xf32>
      %200 = math.exp %199 : vector<4x1x8xf32>
      %cst_114 = arith.constant dense<0.000000e+00> : vector<4x1xf32>
      %201 = vector.multi_reduction <add>, %200, %cst_114 [2] : vector<4x1x8xf32> to vector<4x1xf32>
      %202 = vector.shape_cast %201 : vector<4x1xf32> to vector<4x1x1xf32>
      %203 = tpu.reciprocal %202 {approx = true} : vector<4x1x1xf32> -> vector<4x1x1xf32>
      %204 = vector.broadcast %203 : vector<4x1x1xf32> to vector<4x1x8xf32>
      %205 = arith.mulf %200, %204 : vector<4x1x8xf32>
      %206 = arith.truncf %205 : vector<4x1x8xf32> to vector<4x1x8xbf16>
      "tpu.trace_start"() <{level = 10 : i32, message = "bqk,bkd->bqd"}> : () -> ()
      %cst_115 = arith.constant dense<0.000000e+00> : vector<4x1x8xf32>
      %207 = tpu.matmul %206, %194, %cst_115 {dimension_numbers = #tpu.dot_dimension_numbers<[2], [1], [1], [2], [0, 0, 0, 1, 1, 2], [0], [0]>} : vector<4x1x8xbf16>, vector<4x8x8xbf16>, vector<4x1x8xf32> -> vector<4x1x8xf32>
      "tpu.trace_stop"() : () -> ()
      %208 = vector.shape_cast %153 : vector<4x8x32xbf16> to vector<4x1x8x32xbf16>
      %209 = vector.shape_cast %208 : vector<4x1x8x32xbf16> to vector<4x8x32xbf16>
      %210 = arith.truncf %207 : vector<4x1x8xf32> to vector<4x1x8xbf16>
      "tpu.trace_start"() <{level = 10 : i32, message = "bqd,bde->bqe"}> : () -> ()
      %cst_116 = arith.constant dense<0.000000e+00> : vector<4x1x32xf32>
      %211 = tpu.matmul %210, %209, %cst_116 {dimension_numbers = #tpu.dot_dimension_numbers<[2], [1], [1], [2], [0, 0, 0, 1, 1, 2], [0], [0]>} : vector<4x1x8xbf16>, vector<4x8x32xbf16>, vector<4x1x32xf32> -> vector<4x1x32xf32>
      "tpu.trace_stop"() : () -> ()
      %212 = vector.shape_cast %211 : vector<4x1x32xf32> to vector<4x1x1x32xf32>
      %cst_117 = arith.constant dense<0.000000e+00> : vector<1x1x32xf32>
      %213 = vector.multi_reduction <add>, %212, %cst_117 [0] : vector<4x1x1x32xf32> to vector<1x1x32xf32>
      %214 = vector.shape_cast %213 : vector<1x1x32xf32> to vector<1x32xf32>
      %215 = arith.addf %214, %154 : vector<1x32xf32>
      %216 = arith.addf %215, %162 : vector<1x32xf32>
      %cst_118 = arith.constant dense<0.000000e+00> : vector<1xf32>
      %217 = vector.multi_reduction <add>, %216, %cst_118 [1] : vector<1x32xf32> to vector<1xf32>
      %218 = vector.shape_cast %217 : vector<1xf32> to vector<1x1xf32>
      %cst_119 = arith.constant 3.200000e+01 : f32
      %219 = vector.broadcast %cst_119 : f32 to vector<1x1xf32>
      %220 = arith.divf %218, %219 : vector<1x1xf32>
      %221 = vector.broadcast %220 : vector<1x1xf32> to vector<1x32xf32>
      %222 = arith.subf %216, %221 : vector<1x32xf32>
      %223 = arith.mulf %222, %222 : vector<1x32xf32>
      %cst_120 = arith.constant dense<0.000000e+00> : vector<1xf32>
      %224 = vector.multi_reduction <add>, %223, %cst_120 [1] : vector<1x32xf32> to vector<1xf32>
      %225 = vector.shape_cast %224 : vector<1xf32> to vector<1x1xf32>
      %cst_121 = arith.constant 3.200000e+01 : f32
      %226 = vector.broadcast %cst_121 : f32 to vector<1x1xf32>
      %227 = arith.divf %225, %226 : vector<1x1xf32>
      %cst_122 = arith.constant 9.99999974E-6 : f32
      %228 = vector.broadcast %cst_122 : f32 to vector<1x1xf32>
      %229 = arith.addf %227, %228 : vector<1x1xf32>
      %230 = math.rsqrt %229 : vector<1x1xf32>
      %231 = vector.broadcast %230 : vector<1x1xf32> to vector<1x32xf32>
      %232 = arith.mulf %222, %231 : vector<1x32xf32>
      %233 = arith.mulf %232, %155 : vector<1x32xf32>
      %234 = arith.addf %233, %156 : vector<1x32xf32>
      %235 = arith.truncf %234 : vector<1x32xf32> to vector<1x32xbf16>
      %cst_123 = arith.constant dense<0.000000e+00> : vector<1x32xf32>
      %236 = tpu.matmul %235, %157, %cst_123 {dimension_numbers = #tpu.dot_dimension_numbers<[1], [0], [0], [1], [0, 0, 1, 1], [], []>} : vector<1x32xbf16>, vector<32x32xbf16>, vector<1x32xf32> -> vector<1x32xf32>
      %237 = arith.addf %236, %158 : vector<1x32xf32>
      %cst_124 = arith.constant 0.000000e+00 : f32
      %238 = vector.broadcast %cst_124 : f32 to vector<1x32xf32>
      %239 = arith.maximumf %237, %238 : vector<1x32xf32>
      %240 = arith.mulf %239, %159 : vector<1x32xf32>
      %cst_125 = arith.constant dense<0.000000e+00> : vector<1xf32>
      %241 = vector.multi_reduction <add>, %240, %cst_125 [1] : vector<1x32xf32> to vector<1xf32>
      %242 = vector.shape_cast %241 : vector<1xf32> to vector<1x1xf32>
      %243 = arith.addf %242, %160 : vector<1x1xf32>
      %244 = vector.shape_cast %243 : vector<1x1xf32> to vector<1x1x1xf32>
      %c0_126 = arith.constant 0 : index
      %c0_127 = arith.constant 0 : index
      %c0_128 = arith.constant 0 : index
      %245 = vector.load %arg34[%c0_126, %c0_127, %c0_128] : memref<1x1x1xf32, #tpu.memory_space<vmem>>, vector<1x1x1xf32>
      tpu.vector_store %arg34[%c0_126, %c0_127, %c0_128], %244 {strides = array<i32>} : memref<1x1x1xf32, #tpu.memory_space<vmem>>, vector<1x1x1xf32>,
    } else {
    }
    return
  }
  func.func @transform_0(%arg0: i32, %arg1: i32) -> (i32, i32, i32) {
    %c0_i32 = arith.constant 0 : i32
    %c0_i32_0 = arith.constant 0 : i32
    %c0_i32_1 = arith.constant 0 : i32
    return %arg0, %c0_i32, %c0_i32_0 : i32, i32, i32
  }
  func.func @transform_1(%arg0: i32, %arg1: i32) -> (i32, i32) {
    %c0_i32 = arith.constant 0 : i32
    %c0_i32_0 = arith.constant 0 : i32
    %c0_i32_1 = arith.constant 0 : i32
    return %c0_i32, %c0_i32_0 : i32, i32
  }
  func.func @transform_2(%arg0: i32, %arg1: i32) -> (i32, i32, i32) {
    %c0_i32 = arith.constant 0 : i32
    %c0_i32_0 = arith.constant 0 : i32
    %c0_i32_1 = arith.constant 0 : i32
    return %arg1, %c0_i32, %c0_i32_0 : i32, i32, i32
  }
  func.func @transform_3(%arg0: i32, %arg1: i32) -> (i32, i32, i32) {
    %c0_i32 = arith.constant 0 : i32
    %c0_i32_0 = arith.constant 0 : i32
    %c0_i32_1 = arith.constant 0 : i32
    return %arg1, %c0_i32, %c0_i32_0 : i32, i32, i32
  }
  func.func @transform_4(%arg0: i32, %arg1: i32) -> (i32, i32, i32) {
    %c0_i32 = arith.constant 0 : i32
    %c0_i32_0 = arith.constant 0 : i32
    %c0_i32_1 = arith.constant 0 : i32
    return %arg1, %c0_i32, %c0_i32_0 : i32, i32, i32
  }
  func.func @transform_5(%arg0: i32, %arg1: i32) -> (i32, i32, i32) {
    %c0_i32 = arith.constant 0 : i32
    %c0_i32_0 = arith.constant 0 : i32
    %c0_i32_1 = arith.constant 0 : i32
    return %arg1, %c0_i32, %c0_i32_0 : i32, i32, i32
  }
  func.func @transform_6(%arg0: i32, %arg1: i32) -> (i32, i32, i32) {
    %c0_i32 = arith.constant 0 : i32
    %c0_i32_0 = arith.constant 0 : i32
    %c0_i32_1 = arith.constant 0 : i32
    return %arg1, %c0_i32, %c0_i32_0 : i32, i32, i32
  }
  func.func @transform_7(%arg0: i32, %arg1: i32) -> (i32, i32, i32) {
    %c0_i32 = arith.constant 0 : i32
    %c0_i32_0 = arith.constant 0 : i32
    %c0_i32_1 = arith.constant 0 : i32
    return %arg1, %c0_i32, %c0_i32_0 : i32, i32, i32
  }
  func.func @transform_8(%arg0: i32, %arg1: i32) -> (i32, i32, i32, i32) {
    %c0_i32 = arith.constant 0 : i32
    %c0_i32_0 = arith.constant 0 : i32
    %c0_i32_1 = arith.constant 0 : i32
    %c0_i32_2 = arith.constant 0 : i32
    return %arg1, %c0_i32, %c0_i32_0, %c0_i32_1 : i32, i32, i32, i32
  }
  func.func @transform_9(%arg0: i32, %arg1: i32) -> (i32, i32, i32) {
    %c0_i32 = arith.constant 0 : i32
    %c0_i32_0 = arith.constant 0 : i32
    %c0_i32_1 = arith.constant 0 : i32
    return %arg1, %c0_i32, %c0_i32_0 : i32, i32, i32
  }
  func.func @transform_10(%arg0: i32, %arg1: i32) -> (i32, i32, i32) {
    %c0_i32 = arith.constant 0 : i32
    %c0_i32_0 = arith.constant 0 : i32
    %c0_i32_1 = arith.constant 0 : i32
    return %arg1, %c0_i32, %c0_i32_0 : i32, i32, i32
  }
  func.func @transform_11(%arg0: i32, %arg1: i32) -> (i32, i32, i32) {
    %c0_i32 = arith.constant 0 : i32
    %c0_i32_0 = arith.constant 0 : i32
    %c0_i32_1 = arith.constant 0 : i32
    return %arg1, %c0_i32, %c0_i32_0 : i32, i32, i32
  }
  func.func @transform_12(%arg0: i32, %arg1: i32) -> (i32, i32, i32) {
    %c0_i32 = arith.constant 0 : i32
    %c0_i32_0 = arith.constant 0 : i32
    %c0_i32_1 = arith.constant 0 : i32
    return %arg1, %c0_i32, %c0_i32_0 : i32, i32, i32
  }
  func.func @transform_13(%arg0: i32, %arg1: i32) -> (i32, i32, i32) {
    %c0_i32 = arith.constant 0 : i32
    %c0_i32_0 = arith.constant 0 : i32
    %c0_i32_1 = arith.constant 0 : i32
    return %arg1, %c0_i32, %c0_i32_0 : i32, i32, i32
  }
  func.func @transform_14(%arg0: i32, %arg1: i32) -> (i32, i32, i32) {
    %c0_i32 = arith.constant 0 : i32
    %c0_i32_0 = arith.constant 0 : i32
    %c0_i32_1 = arith.constant 0 : i32
    return %arg1, %c0_i32, %c0_i32_0 : i32, i32, i32
  }
  func.func @transform_15(%arg0: i32, %arg1: i32) -> (i32, i32, i32) {
    %c0_i32 = arith.constant 0 : i32
    %c0_i32_0 = arith.constant 0 : i32
    %c0_i32_1 = arith.constant 0 : i32
    return %arg1, %c0_i32, %c0_i32_0 : i32, i32, i32
  }
  func.func @transform_16(%arg0: i32, %arg1: i32) -> (i32, i32, i32) {
    %c0_i32 = arith.constant 0 : i32
    %c0_i32_0 = arith.constant 0 : i32
    %c0_i32_1 = arith.constant 0 : i32
    return %arg1, %c0_i32, %c0_i32_0 : i32, i32, i32
  }
  func.func @transform_17(%arg0: i32, %arg1: i32) -> (i32, i32, i32) {
    %c0_i32 = arith.constant 0 : i32
    %c0_i32_0 = arith.constant 0 : i32
    %c0_i32_1 = arith.constant 0 : i32
    return %arg1, %c0_i32, %c0_i32_0 : i32, i32, i32
  }
  func.func @transform_18(%arg0: i32, %arg1: i32) -> (i32, i32) {
    %c0_i32 = arith.constant 0 : i32
    %c0_i32_0 = arith.constant 0 : i32
    %c0_i32_1 = arith.constant 0 : i32
    return %c0_i32, %c0_i32_0 : i32, i32
  }
  func.func @transform_19(%arg0: i32, %arg1: i32) -> (i32, i32) {
    %c0_i32 = arith.constant 0 : i32
    %c0_i32_0 = arith.constant 0 : i32
    %c0_i32_1 = arith.constant 0 : i32
    return %c0_i32, %c0_i32_0 : i32, i32
  }
  func.func @transform_20(%arg0: i32, %arg1: i32) -> (i32, i32) {
    %c0_i32 = arith.constant 0 : i32
    %c0_i32_0 = arith.constant 0 : i32
    %c0_i32_1 = arith.constant 0 : i32
    return %c0_i32, %c0_i32_0 : i32, i32
  }
  func.func @transform_21(%arg0: i32, %arg1: i32) -> (i32, i32) {
    %c0_i32 = arith.constant 0 : i32
    %c0_i32_0 = arith.constant 0 : i32
    %c0_i32_1 = arith.constant 0 : i32
    return %c0_i32, %c0_i32_0 : i32, i32
  }
  func.func @transform_22(%arg0: i32, %arg1: i32) -> (i32, i32) {
    %c0_i32 = arith.constant 0 : i32
    %c0_i32_0 = arith.constant 0 : i32
    %c0_i32_1 = arith.constant 0 : i32
    return %c0_i32, %c0_i32_0 : i32, i32
  }
  func.func @transform_23(%arg0: i32, %arg1: i32) -> (i32, i32) {
    %c0_i32 = arith.constant 0 : i32
    %c0_i32_0 = arith.constant 0 : i32
    %c0_i32_1 = arith.constant 0 : i32
    return %c0_i32, %c0_i32_0 : i32, i32
  }
  func.func @transform_24(%arg0: i32, %arg1: i32) -> (i32, i32, i32) {
    %c0_i32 = arith.constant 0 : i32
    %c0_i32_0 = arith.constant 0 : i32
    %c0_i32_1 = arith.constant 0 : i32
    %c0_i32_2 = arith.constant 0 : i32
    return %c0_i32, %c0_i32_0, %c0_i32_1 : i32, i32, i32
  }
  func.func @transform_25(%arg0: i32, %arg1: i32) -> (i32, i32) {
    %c0_i32 = arith.constant 0 : i32
    %c0_i32_0 = arith.constant 0 : i32
    %c0_i32_1 = arith.constant 0 : i32
    return %c0_i32, %c0_i32_0 : i32, i32
  }
  func.func @transform_26(%arg0: i32, %arg1: i32) -> (i32, i32) {
    %c0_i32 = arith.constant 0 : i32
    %c0_i32_0 = arith.constant 0 : i32
    %c0_i32_1 = arith.constant 0 : i32
    return %c0_i32, %c0_i32_0 : i32, i32
  }
  func.func @transform_27(%arg0: i32, %arg1: i32) -> (i32, i32) {
    %c0_i32 = arith.constant 0 : i32
    %c0_i32_0 = arith.constant 0 : i32
    %c0_i32_1 = arith.constant 0 : i32
    return %c0_i32, %c0_i32_0 : i32, i32
  }
  func.func @transform_28(%arg0: i32, %arg1: i32) -> (i32, i32) {
    %c0_i32 = arith.constant 0 : i32
    %c0_i32_0 = arith.constant 0 : i32
    %c0_i32_1 = arith.constant 0 : i32
    return %c0_i32, %c0_i32_0 : i32, i32
  }
  func.func @transform_29(%arg0: i32, %arg1: i32) -> (i32, i32) {
    %c0_i32 = arith.constant 0 : i32
    %c0_i32_0 = arith.constant 0 : i32
    %c0_i32_1 = arith.constant 0 : i32
    return %c0_i32, %c0_i32_0 : i32, i32
  }
  func.func @transform_30(%arg0: i32, %arg1: i32) -> (i32, i32) {
    %c0_i32 = arith.constant 0 : i32
    %c0_i32_0 = arith.constant 0 : i32
    %c0_i32_1 = arith.constant 0 : i32
    return %c0_i32, %c0_i32_0 : i32, i32
  }
  func.func @transform_31(%arg0: i32, %arg1: i32) -> (i32, i32) {
    %c0_i32 = arith.constant 0 : i32
    %c0_i32_0 = arith.constant 0 : i32
    %c0_i32_1 = arith.constant 0 : i32
    return %c0_i32, %c0_i32_0 : i32, i32
  }
  func.func @transform_32(%arg0: i32, %arg1: i32) -> (i32, i32, i32) {
    %c0_i32 = arith.constant 0 : i32
    %c0_i32_0 = arith.constant 0 : i32
    %c0_i32_1 = arith.constant 0 : i32
    return %arg0, %c0_i32, %c0_i32_0 : i32, i32, i32
  }
}

</mosaic_0001>

<bundles_post_ra>
// kernel: tpu_custom_call.1
= control target key start
LH: loop header
LB: loop body
LE: loop exit
PB: predicated region body
PF: predicated region fallthrough
CT: control target
= control target key end

     0   :  { %s4140_s6 = smov 1   ;;  %s4141_s10 = smov 2   ;;  %s4967_s0 = inlined_call_operand.smem [shape: u32[33], index: -1, kind: input, shape index: {}] }
   0x1   :  { %s4196_s5 = sld [smem:[%s4967_s0]]   ;;  %s4142_s14 = smov 3  }
   0x2   :  { %s4201_s9 = sld [smem:[%s4967_s0 + %s4140_s6]]   ;;  %s4143_s18 = smov 4  }
   0x3   :  { %s4206_s13 = sld [smem:[%s4967_s0 + %s4141_s10]]   ;;  %s4144_s22 = smov 5  }
   0x4   :  { %s4211_s17 = sld [smem:[%s4967_s0 + %s4142_s14]]   ;;  %s4145_s26 = smov 6  }
   0x5   :  { %s4216_s21 = sld [smem:[%s4967_s0 + %s4143_s18]]   ;;  %s4146_s30 = smov 7  }
   0x6   :  { %s4221_s25 = sld [smem:[%s4967_s0 + %s4144_s22]]   ;;  %s4147_s4 = smov 8  }
   0x7   :  { %5008 = sst [smem:[#allocation33_spill]] %s4196_s5  ;;  %s4148_s10 = smov 9  }
   0x8   :  { %5009 = sst [smem:[#allocation34_spill]] %s4201_s9  ;;  %s4149_s15 = smov 10  }
   0x9   :  { %5010 = sst [smem:[#allocation35_spill]] %s4206_s13  ;;  %s4150_s20 = smov 11  }
   0xa   :  { %5011 = sst [smem:[#allocation36_spill]] %s4211_s17  ;;  %s4152_s1 = smov 13  }
   0xb   :  { %5012 = sst [smem:[#allocation37_spill]] %s4216_s21  ;;  %s4153_s7 = smov 14  }
   0xc   :  { %s4226_s29 = sld [smem:[%s4967_s0 + %s4145_s26]]   ;;  %s4151_s26 = smov 12  }
   0xd   :  { %s4231_s3 = sld [smem:[%s4967_s0 + %s4146_s30]]   ;;  %s4155_s22 = smov 16  }
   0xe   :  { %s4236_s8 = sld [smem:[%s4967_s0 + %s4147_s4]]   ;;  %s4156_s28 = smov 17  }
   0xf   :  { %s4241_s14 = sld [smem:[%s4967_s0 + %s4148_s10]]   ;;  %s4171_s23 = smov 32  }
  0x10   :  { %s4246_s19 = sld [smem:[%s4967_s0 + %s4149_s15]]   ;;  %s4154_s15 = smov 15  }
  0x11   :  { %s4251_s24 = sld [smem:[%s4967_s0 + %s4150_s20]]  }
  0x12   :  { %5013 = sst [smem:[#allocation38_spill]] %s4226_s29 }
  0x13   :  { %5014 = sst [smem:[#allocation39_spill]] %s4231_s3 }
  0x14   :  { %5015 = sst [smem:[#allocation40_spill]] %s4236_s8 }
  0x15   :  { %5016 = sst [smem:[#allocation41_spill]] %s4241_s14 }
  0x16   :  { %s4256_s30 = sld [smem:[%s4967_s0 + %s4151_s26]]  }
  0x17   :  { %5017 = sst [smem:[#allocation42_spill]] %s4251_s24 }
  0x18   :  { %s4261_s6 = sld [smem:[%s4967_s0 + %s4152_s1]]  }
  0x19   :  { %s4266_s12 = sld [smem:[%s4967_s0 + %s4153_s7]]   ;;  %s4157_s7 = smov 18  }
  0x1a   :  { %s4271_s20 = sld [smem:[%s4967_s0 + %s4154_s15]]   ;;  %s4158_s15 = smov 19  }
  0x1b   :  { %s4276_s27 = sld [smem:[%s4967_s0 + %s4155_s22]]   ;;  %s4159_s22 = smov 20  }
  0x1c   :  { %5018 = sst [smem:[#allocation43_spill]] %s4256_s30 }
  0x1d   :  { %s4281_s4 = sld [smem:[%s4967_s0 + %s4156_s28]]   ;;  %s4160_s28 = smov 21  }
  0x1e   :  { %5019 = sst [smem:[#allocation44_spill]] %s4261_s6 }
  0x1f   :  { %5020 = sst [smem:[#allocation45_spill]] %s4266_s12 }
  0x20   :  { %5021 = sst [smem:[#allocation46_spill]] %s4271_s20 }
  0x21   :  { %5022 = sst [smem:[#allocation47_spill]] %s4276_s27 }
  0x22   :  { %s4286_s12 = sld [smem:[%s4967_s0 + %s4157_s7]]   ;;  %s4161_s7 = smov 22  }
  0x23   :  { %5023 = sst [smem:[#allocation48_spill]] %s4281_s4 }
  0x24   :  { %s4291_s29 = sld [smem:[%s4967_s0 + %s4158_s15]]   ;;  %s4162_s15 = smov 23  }
  0x25   :  { %s4296_s21 = sld [smem:[%s4967_s0 + %s4159_s22]]   ;;  %s4163_s22 = smov 24  }
  0x26   :  { %s4301_s13 = sld [smem:[%s4967_s0 + %s4160_s28]]   ;;  %s4164_s28 = smov 25  }
  0x27   :  { %s4316_s4 = sld [smem:[%s4967_s0 + %s4163_s22]]   ;;  %s4167_s22 = smov 28  }
  0x28   :  { %5024 = sst [smem:[#allocation49_spill]] %s4286_s12 }
  0x29   :  { %s4306_s12 = sld [smem:[%s4967_s0 + %s4161_s7]]   ;;  %s4165_s7 = smov 26  }
  0x2a   :  { %5025 = sst [smem:[#allocation50_spill]] %s4291_s29 }
  0x2b   :  { %s4311_s29 = sld [smem:[%s4967_s0 + %s4162_s15]]   ;;  %s4166_s15 = smov 27  }
  0x2c   :  { %5026 = sst [smem:[#allocation51_spill]] %s4301_s13 }
  0x2d   :  { %5029 = sst [smem:[#allocation54_spill]] %s4316_s4 }
  0x2e   :  { %s4321_s13 = sld [smem:[%s4967_s0 + %s4164_s28]]   ;;  %s4168_s28 = smov 29  }
  0x2f   :  { %5027 = sst [smem:[#allocation52_spill]] %s4306_s12 }
  0x30   :  { %s4326_s27 = sld [smem:[%s4967_s0 + %s4165_s7]]   ;;  %s4169_s7 = smov 30  }
  0x31   :  { %5028 = sst [smem:[#allocation53_spill]] %s4311_s29 }
  0x32   :  { %s4331_s29 = sld [smem:[%s4967_s0 + %s4166_s15]]   ;;  %s4170_s15 = smov 31  }
  0x33   :  { %s4336_s20 = sld [smem:[%s4967_s0 + %s4167_s22]]  }
  0x34   :  { %5030 = sst [smem:[#allocation55_spill]] %s4321_s13 }
  0x35   :  { %s4341_s13 = sld [smem:[%s4967_s0 + %s4168_s28]]  }
  0x36   :  { %5031 = sst [smem:[#allocation56_spill]] %s4326_s27 }
  0x37   :  { %s4346_s27 = sld [smem:[%s4967_s0 + %s4169_s7]]  }
  0x38   :  { %5032 = sst [smem:[#allocation57_spill]] %s4331_s29 }
  0x39   :  { %s3075_s29 = sld [smem:[%s4967_s0 + %s4170_s15]]  }
  0x3a   :  { %s4354_s6 = sld [smem:[%s4967_s0 + %s4171_s23]]  }
  0x3b   :  { %5033 = sst [smem:[#allocation58_spill]] %s4341_s13 }
  0x3d   :  { %5034 = sst [smem:[#allocation59_spill]] %s4346_s27 }
  0x3f   :  { %v70_v0 = vstv %s3075_s29 }
  0x40   :  { %5035 = sst [smem:[#allocation60_spill]] %s4354_s6  ;;  %71 = vst [vmem:[#allocation4] sm:$0x1] %v70_v0 }
  0x41   :  { %72 = vsyncpa [#allocation6], 0 }
  0x42   :  { %74 = vsyncpa [#allocation6 + $0x1], 0 }
  0x43   :  { %75 = vsyncpa [#allocation8], 0 }
  0x44   :  { %76 = vsyncpa [#allocation23], 0 }
  0x45   :  { %77 = vsyncpa [#allocation26], 0  ;;  %s4356_s28 = smov 0   ;;  %s4358_s1 = smov 0  }
  0x46   :  { %s4360_s2 = smov 0   ;;  %s4362_s7 = smov 0  }
  0x47   :  { %s4364_s10 = smov 0   ;;  %s4366_s11 = smov 0  }
  0x48   :  { %s4368_s0 = smov 0   ;;  %s4370_s29 = smov 0  }
  0x49   :  { %5036 = sst [smem:[#allocation61_spill]] %s4368_s0  ;;  %s4372_s15 = smov 0  }
  0x4a   :  { %s4374_s16 = smov 0   ;;  %s4376_s18 = smov 0  }
  0x4b LB: > { %s5038_s17 = sld [smem:[#allocation36_spill]]  ;;  %s4974_s23 = sadd.s32 4294967295, %s4138_s18   ;;  %s4126_s29 = sphi %s4370_s29, %s5131_s29   ;;  %s4118_s11 = sphi %s4366_s11, %s5129_s11   ;;  %s4114_s10 = sphi %s4364_s10, %s5128_s10   ;;  %s4110_s7 = sphi %s4362_s7, %s5122_s7   ;;  %s4106_s2 = sphi %s4360_s2, %s5127_s2   ;;  %s4102_s1 = sphi %s4358_s1, %s5126_s1   ;;  %s4098_s28 = sphi %s4356_s28, %s5120_s28   ;;  %s4138_s18 = sphi %s4376_s18, %s83_s18   ;;  %s4134_s16 = sphi %s4374_s16, %s5133_s16   ;;  %s4130_s15 = sphi %s4372_s15, %s5132_s15  }
  0x4c   : > { %s5039_s14 = sld [smem:[#allocation41_spill]]  ;;  %s92_s22 = sadd.s32 1, %s4130_s15 }
  0x4d   : > { %s5040_s12 = sld [smem:[#allocation52_spill]]  ;;  %p93_p0 = scmp.ge.s32.totalorder %s92_s22, 2 }
  0x4e   : > { %s5041_s8 = sld [smem:[#allocation40_spill]]  ;;  %s95_s26 = sadd.s32 1, %s4134_s16 }
  0x4f   : > { %s5042_s5 = sld [smem:[#allocation33_spill]]  ;;  %s102_s27 = sadd.s32 1, %s4118_s11 }
  0x50   : > { %s5043_s4 = sld [smem:[#allocation54_spill]]  ;;  %p109_p1 = scmp.ne.s32.totalorder %s4118_s11, %s4114_s10 }
  0x51   : > { %s5044_s3 = sld [smem:[#allocation39_spill]]  ;;  %s5135_s22 = smov (%p93_p0, %s92_s22), 0 }
  0x52   : > { %s5045_s9 = sld [smem:[#allocation34_spill]]  ;;  %s5137_s26 = smov (!%p93_p0, %s95_s26), %s4134_s16 }
  0x53   : > { %s5046_s0 = sld [smem:[#allocation61_spill]]  ;;  %p110_p2 = scmp.eq.s32.totalorder %s4138_s18, 0 }
  0x54   : > { %5047 = sst [smem:[#allocation61_spill]] %s4102_s1  ;;  %p115_p3 = scmp.ne.s32.totalorder %s4114_s10, %s4110_s7 }
  0x55   : > { %5048 = sst [smem:[#allocation62_spill]] %s4114_s10  ;;  %p97_p4 = scmp.ge.s32.totalorder %s5137_s26, 2 }
  0x56   : > { %5050 = sst [smem:[#allocation64_spill]] %s4126_s29  ;;  %p4422_p5 = scmp.eq.s32.totalorder %s4974_s23, 0 }
  0x57   : > { %5051 = sst [smem:[#allocation65_spill]] %s5135_s22  ;;  %p4428_p6 = por %p110_p2, %p109_p1 }
  0x58   : > { %s5052_s13 = scalar_select %p4422_p5, 1, 0 }
  0x59   : > { %5049 = sst [smem:[#allocation63_spill]] %s5046_s0  ;;  %s172_s29 = ssub.s32 %s4130_s15, %s5135_s22 }
  0x5a   : > { %5053 = sst [smem:[#allocation66_spill]] %s5052_s13  ;;  %s5139_s26 = smov (%p97_p4, %s5137_s26), 0 }
  0x5b   : > { %5055 = sst [smem:[#allocation67_spill]] %s5139_s26  ;;  %p4438_p7 = por %p4422_p5, %p115_p3 }
  0x5c   : > { %p173_p8 = scmp.eq.s32.totalorder %s172_s29, 0  ;;  %s99_s23 = ssub.s32 %s4134_s16, %s5139_s26 }
  0x5d   : > { %s5056_s7 = scalar_select %p4438_p7, 1, 0 }
  0x5e   : > { %s175_s0 = sadd.s32 1, %s4106_s2  ;;  %p100_p9 = scmp.eq.s32.totalorder %s99_s23, 0 }
  0x5f   : > { %5057 = sst [smem:[#allocation68_spill]] %s5056_s7  ;;  %p182_p10 = scmp.ne.s32.totalorder %s4106_s2, %s4102_s1 }
  0x60   : > { %s4448_s10 = scalar_select %p173_p8, %s4106_s2, %s175_s0  }
  0x61   : > { %s4451_s30 = scalar_select %p100_p9, %s4118_s11, %s102_s27  }
  0x62   : > { %5058 = sst [smem:[#allocation69_spill]] %s4448_s10  ;;  %p4455_p11 = por %p182_p10, %p110_p2 }
  0x63   : > { %5059 = sst [smem:[#allocation70_spill]] %s4451_s30  ;;  %p188_p12 = scmp.ne.s32.totalorder %s4102_s1, %s4098_s28 }
  0x64   : > { %p3079_p13 = scmp.ge.s32.totalorder %s4138_s18, 1  ;;  %p883_p0 = scmp.lt.s32.totalorder %s4138_s18, 5 }
  0x65   : > { %p4465_p1 = por %p188_p12, %p4422_p5  ;;  %s895_s27 = sshll.u32 %s5045_s9, 4  ;;  %s896_s27 = int_to_ptr.hbm [resolvable:$true] %s895_s27 }
  0x66   : > { %p4469_p3 = pnand %p3079_p13, %p883_p0  ;;  %s4172_s0 = smov [#allocation7]  }
  0x67   : > { %s5061_s29 = scalar_select %p4465_p1, 1, 0 }
  0x68   : > { %s5063_s23 = scalar_select %p4469_p3, 1, 0 }
  0x69   : > { %5062 = sst [smem:[#allocation71_spill]] %s5061_s29  ;;  %p3300_p2 = pneg %p4469_p3 }
  0x6a   : > { %5064 = sst [smem:[#allocation72_spill]] %s5063_s23  ;;  %s897_s28 = sshll.u32 %s4172_s0, 4  ;;  %s898_s28 = int_to_ptr.vmem [resolvable:$true] %s897_s28 }
  0x6b   : > { %p4478_p4 = pnand %p3300_p2, %p4422_p5  ;;  %s929_s30 = sshll.u32 %s5040_s12, 4  ;;  %s4483_s30 = int_to_ptr.hbm [resolvable:$true] %s929_s30 }
  0x6c   : > { %s3514_s10 = sshra.s32 %s896_s27, 4  ;;  %s3521_s0 = scalar_lea.hbm %s5045_s9, 8  ;;  %s3515_s10 = int_to_ptr.hbm [resolvable:$true] %s3514_s10 }
  0x6d   : > { %s3516_s29 = scalar_lea.hbm %s3515_s10, 8  ;;  %p4487_p9 = pneg %p4478_p4 }
  0x6e   : > { %p3517_p8 = scmp.ne.s32.totalorder %s3515_s10, %s3516_s29  ;;  %p3522_p13 = scmp.lt.s32.totalorder %s3515_s10, %s5045_s9 }
  0x6f   : > { %p3523_p0 = scmp.lt.s32.totalorder %s3521_s0, %s3516_s29 }
  0x70   : > { %p3519_p10 = pnand %p4487_p9, %p3517_p8 }
  0x71   : > { %p3524_p2 = por %p3523_p0, %p3522_p13 }
  0x72   : > { %p3520_p12 = pneg %p3519_p10 }
  0x74   : > { %p3525_p1 = pnand %p3524_p2, %p3520_p12 }
  0x76   : > { %3528 = shalt.err (!%p3525_p1)
}
  0x77   : > { %3303 = dma.hbm_to_vmem [thread:$0]  (!%p4478_p4), %s896_s27, 128, %s898_s28, [#allocation8]  }
  0x78   : > { %s4173_s13 = smov [#allocation22]   ;;  %s912_s23 = sshll.u32 %s4296_s21, 4  ;;  %s4498_s23 = int_to_ptr.hbm [resolvable:$true] %s912_s23 }
  0x79   : > { %s931_s7 = sshll.u32 %s4173_s13, 4  ;;  %s3544_s24 = sshra.s32 %s4483_s30, 4  ;;  %s932_s7 = int_to_ptr.vmem [resolvable:$true] %s931_s7  ;;  %s3545_s24 = int_to_ptr.hbm [resolvable:$true] %s3544_s24 }
  0x7a   : > { %s3546_s10 = scalar_lea.hbm %s3545_s24, 16  ;;  %s3551_s29 = scalar_lea.hbm %s5040_s12, 16 }
  0x7b   : > { %p3547_p8 = scmp.ne.s32.totalorder %s3545_s24, %s3546_s10  ;;  %p3552_p12 = scmp.lt.s32.totalorder %s3545_s24, %s5040_s12 }
  0x7c   : > { %p3553_p13 = scmp.lt.s32.totalorder %s3551_s29, %s3546_s10 }
  0x7d   : > { %p3549_p1 = pnand %p3547_p8, %p4487_p9 }
  0x7e   : > { %p3554_p0 = por %p3553_p13, %p3552_p12 }
  0x7f   : > { %p3550_p10 = pneg %p3549_p1 }
  0x81   : > { %p3555_p2 = pnand %p3554_p0, %p3550_p10 }
  0x83   : > { %3558 = shalt.err (!%p3555_p2)
}
  0x84   : > { %s4174_s27 = smov 64   ;;  %s4175_s13 = smov 4  }
  0x85   : > { %3309 = dma.hbm_to_vmem [thread:$0]  (!%p4478_p4), %s4483_s30, 256, %s932_s7, [#allocation23], %s4174_s27, %s4174_s27, %s4175_s13  }
  0x86   : > { %s946_s28 = sshll.u32 %s5043_s4, 4  ;;  %s4176_s24 = smov [#allocation21]   ;;  %s4512_s28 = int_to_ptr.hbm [resolvable:$true] %s946_s28 }
  0x87   : > { %s914_s0 = sshll.u32 %s4176_s24, 4  ;;  %s3574_s10 = sshra.s32 %s4498_s23, 4  ;;  %s915_s0 = int_to_ptr.vmem [resolvable:$true] %s914_s0  ;;  %s3575_s10 = int_to_ptr.hbm [resolvable:$true] %s3574_s10 }
  0x88   : > { %s3576_s29 = scalar_lea.hbm %s3575_s10, 16  ;;  %s3581_s9 = scalar_lea.hbm %s4296_s21, 16 }
  0x89   : > { %p3577_p8 = scmp.ne.s32.totalorder %s3575_s10, %s3576_s29  ;;  %p3582_p12 = scmp.lt.s32.totalorder %s3575_s10, %s4296_s21 }
  0x8a   : > { %p3583_p13 = scmp.lt.s32.totalorder %s3581_s9, %s3576_s29 }
  0x8b   : > { %p3579_p1 = pnand %p3577_p8, %p4487_p9 }
  0x8c   : > { %p3584_p0 = por %p3583_p13, %p3582_p12 }
  0x8d   : > { %p3580_p10 = pneg %p3579_p1 }
  0x8f   : > { %p3585_p2 = pnand %p3584_p0, %p3580_p10 }
  0x91   : > { %3588 = shalt.err (!%p3585_p2)
}
  0x92   : > { %3306 = dma.hbm_to_vmem [thread:$0]  (!%p4478_p4), %s4498_s23, 256, %s915_s0, [#allocation8], %s4174_s27, %s4174_s27, %s4175_s13  }
  0x93   : > { %s4177_s30 = smov [#allocation24]   ;;  %s969_s24 = sshll.u32 %s4336_s20, 4  ;;  %s970_s24 = int_to_ptr.hbm [resolvable:$true] %s969_s24 }
  0x94   : > { %s948_s7 = sshll.u32 %s4177_s30, 4  ;;  %s3604_s9 = sshra.s32 %s4512_s28, 4  ;;  %s949_s7 = int_to_ptr.vmem [resolvable:$true] %s948_s7  ;;  %s3605_s9 = int_to_ptr.hbm [resolvable:$true] %s3604_s9 }
  0x95   : > { %s3606_s10 = scalar_lea.hbm %s3605_s9, 16  ;;  %s3611_s29 = scalar_lea.hbm %s5043_s4, 16 }
  0x96   : > { %p3607_p8 = scmp.ne.s32.totalorder %s3605_s9, %s3606_s10  ;;  %p3612_p12 = scmp.lt.s32.totalorder %s3605_s9, %s5043_s4 }
  0x97   : > { %p3613_p13 = scmp.lt.s32.totalorder %s3611_s29, %s3606_s10 }
  0x98   : > { %p3609_p1 = pnand %p3607_p8, %p4487_p9 }
  0x99   : > { %p3614_p0 = por %p3613_p13, %p3612_p12 }
  0x9a   : > { %p3610_p10 = pneg %p3609_p1 }
  0x9c   : > { %p3615_p2 = pnand %p3614_p0, %p3610_p10 }
  0x9e   : > { %3618 = shalt.err (!%p3615_p2)
}
  0x9f   : > { %3312 = dma.hbm_to_vmem [thread:$0]  (!%p4478_p4), %s4512_s28, 256, %s949_s7, [#allocation23], %s4174_s27, %s4174_s27, %s4175_s13  }
  0xa0   : > { %s4178_s23 = smov [#allocation25]   ;;  %s3634_s30 = sshra.s32 %s970_s24, 4  ;;  %s3635_s30 = int_to_ptr.hbm [resolvable:$true] %s3634_s30 }
  0xa1   : > { %s971_s0 = sshll.u32 %s4178_s23, 4  ;;  %s3636_s9 = scalar_lea.hbm %s3635_s30, 16  ;;  %s972_s0 = int_to_ptr.vmem [resolvable:$true] %s971_s0 }
  0xa2   : > { %p3637_p8 = scmp.ne.s32.totalorder %s3635_s30, %s3636_s9  ;;  %s3641_s10 = scalar_lea.hbm %s4336_s20, 16 }
  0xa3   : > { %p3642_p12 = scmp.lt.s32.totalorder %s3635_s30, %s4336_s20  ;;  %p3643_p13 = scmp.lt.s32.totalorder %s3641_s10, %s3636_s9 }
  0xa4   : > { %p3639_p1 = pnand %p3637_p8, %p4487_p9 }
  0xa5   : > { %p3644_p0 = por %p3643_p13, %p3642_p12 }
  0xa6   : > { %p3640_p10 = pneg %p3639_p1 }
  0xa8   : > { %p3645_p2 = pnand %p3644_p0, %p3640_p10 }
  0xaa   : > { %3648 = shalt.err (!%p3645_p2)
}
  0xab   : > { %3315 = dma.hbm_to_vmem [thread:$0]  (!%p4478_p4), %s970_s24, 256, %s972_s0, [#allocation26], %s4174_s27, %s4174_s27, %s4175_s13  }
  0xac   : > { %p3085_p5 = scmp.ge.s32.totalorder %s4138_s18, 4 }
  0xad   : > { %s994_s1 = sand.u32 (!%p3085_p5), 1, %s4138_s18   ;;  %s996_s28 = sand.u32 (!%p3085_p5), 1, %s4118_s11  }
  0xae   : > { %990 = sbr.rel (%p3085_p5) target bundleno = 391 (0x187), region = 76  ;;  %s3086_s7 = sshll.u32 (!%p3085_p5), %s996_s28, 3 }
  0xaf   : > { %s3087_s29 = sshll.u32 (!%p3085_p5), %s4134_s16, 3  ;;  %s998_s23 = scalar_lea.vmem (!%p3085_p5), [#allocation5], %s3086_s7 }
  0xb0   : > { %s1002_s26 = scalar_lea.hbm (!%p3085_p5), %s5042_s5, %s3087_s29  ;;  %s1006_s30 = sshll.u32 (!%p3085_p5), %s998_s23, 4  ;;  %s1007_s30 = int_to_ptr.vmem [resolvable:$true] %s1006_s30 }
  0xb1   : > { %s1004_s9 = sshll.u32 (!%p3085_p5), %s1002_s26, 4  ;;  %s4552_s27 = sand.u32 (!%p3085_p5), 1, %s4106_s2   ;;  %s1005_s9 = int_to_ptr.hbm [resolvable:$true] %s1004_s9 }
  0xb2   : > { %s4554_s13 = scalar_lea.sflag (!%p3085_p5), [#allocation6], %s994_s1  ;;  %s3664_s24 = sshra.s32 (!%p3085_p5), %s1005_s9, 4  ;;  %s3665_s24 = int_to_ptr.hbm [resolvable:$true] %s3664_s24 }
  0xb3   : > { %s3666_s0 = scalar_lea.hbm %s3665_s24, 8  ;;  %s3670_s10 = scalar_lea.hbm %s5042_s5, 16 }
  0xb4   : > { %p3667_p5 = scmp.ne.s32.totalorder %s3665_s24, %s3666_s0  ;;  %p3671_p8 = scmp.lt.s32.totalorder %s3665_s24, %s5042_s5 }
  0xb5   : > { %p3672_p1 = scmp.lt.s32.totalorder %s3670_s10, %s3666_s0 }
  0xb6   : > { %p3668_p4 = pnand %p3667_p5, %p4428_p6 }
  0xb7   : > { %p3673_p10 = por %p3672_p1, %p3671_p8 }
  0xb8   : > { %p3669_p9 = pneg %p3668_p4 }
  0xba   : > { %p3674_p12 = pnand %p3673_p10, %p3669_p9 }
  0xbc   : > { %3677 = shalt.err (!%p3674_p12)
}
  0xbd   : > { %3264 = dma.hbm_to_vmem [thread:$0]  (%p4428_p6), %s1005_s9, 128, %s1007_s30, %s4554_s13  }
  0xbe   : > { %s1027_s1 = scalar_lea.hbm %s5038_s17, %s4130_s15  ;;  %s1024_s7 = scalar_lea.vmem [#allocation9], %s4552_s27 }
  0xbf   : > { %s1029_s28 = sshll.u32 %s1027_s1, 4  ;;  %s1031_s29 = sshll.u32 %s1024_s7, 4  ;;  %s1030_s28 = int_to_ptr.hbm [resolvable:$true] %s1029_s28  ;;  %s1032_s29 = int_to_ptr.vmem [resolvable:$true] %s1031_s29 }
  0xc0   : > { %s3692_s26 = sshra.s32 %s1030_s28, 4  ;;  %s3698_s6 = scalar_lea.hbm %s5038_s17, 2  ;;  %s3693_s26 = int_to_ptr.hbm [resolvable:$true] %s3692_s26 }
  0xc1   : > { %s3694_s23 = scalar_lea.hbm %s3693_s26, 1  ;;  %p3699_p5 = scmp.lt.s32.totalorder %s3693_s26, %s5038_s17 }
  0xc2   : > { %p3695_p13 = scmp.ne.s32.totalorder %s3693_s26, %s3694_s23  ;;  %p3700_p4 = scmp.lt.s32.totalorder %s3698_s6, %s3694_s23 }
  0xc4   : > { %p3696_p0 = pnand %p3695_p13, %p4455_p11  ;;  %p3701_p9 = por %p3700_p4, %p3699_p5 }
  0xc6   : > { %p3697_p2 = pneg %p3696_p0 }
  0xc8   : > { %p3702_p8 = pnand %p3701_p9, %p3697_p2 }
  0xca   : > { %3705 = shalt.err (!%p3702_p8)
}
  0xcb   : > { %3265 = dma.hbm_to_vmem [thread:$0]  (%p4455_p11), %s1030_s28, 16, %s1032_s29, %s4554_s13  }
  0xcc   : > { %s1052_s30 = scalar_lea.hbm %s4221_s25, %s4130_s15  ;;  %s1049_s24 = scalar_lea.vmem [#allocation10], %s4552_s27 }
  0xcd   : > { %s1054_s9 = sshll.u32 %s1052_s30, 4  ;;  %s1056_s0 = sshll.u32 %s1049_s24, 4  ;;  %s1055_s9 = int_to_ptr.hbm [resolvable:$true] %s1054_s9  ;;  %s1057_s0 = int_to_ptr.vmem [resolvable:$true] %s1056_s0 }
  0xce   : > { %s3720_s10 = sshra.s32 %s1055_s9, 4  ;;  %s3726_s7 = scalar_lea.hbm %s4221_s25, 2  ;;  %s3721_s10 = int_to_ptr.hbm [resolvable:$true] %s3720_s10 }
  0xcf   : > { %s3722_s1 = scalar_lea.hbm %s3721_s10, 1  ;;  %p3727_p12 = scmp.lt.s32.totalorder %s3721_s10, %s4221_s25 }
  0xd0   : > { %p3723_p6 = scmp.ne.s32.totalorder %s3721_s10, %s3722_s1  ;;  %p3728_p13 = scmp.lt.s32.totalorder %s3726_s7, %s3722_s1 }
  0xd2   : > { %p3724_p1 = pnand %p3723_p6, %p4455_p11  ;;  %p3729_p0 = por %p3728_p13, %p3727_p12 }
  0xd4   : > { %p3725_p10 = pneg %p3724_p1 }
  0xd6   : > { %p3730_p2 = pnand %p3729_p0, %p3725_p10 }
  0xd8   : > { %3733 = shalt.err (!%p3730_p2)
}
  0xd9   : > { %3266 = dma.hbm_to_vmem [thread:$0]  (%p4455_p11), %s1055_s9, 16, %s1057_s0, %s4554_s13  }
  0xda   : > { %s1077_s28 = scalar_lea.hbm %s5044_s3, %s4130_s15  ;;  %s1074_s26 = scalar_lea.vmem [#allocation11], %s4552_s27 }
  0xdb   : > { %s1079_s29 = sshll.u32 %s1077_s28, 4  ;;  %s1081_s23 = sshll.u32 %s1074_s26, 4  ;;  %s1080_s29 = int_to_ptr.hbm [resolvable:$true] %s1079_s29  ;;  %s1082_s23 = int_to_ptr.vmem [resolvable:$true] %s1081_s23 }
  0xdc   : > { %s3748_s6 = sshra.s32 %s1080_s29, 4  ;;  %s3754_s24 = scalar_lea.hbm %s5044_s3, 2  ;;  %s3749_s6 = int_to_ptr.hbm [resolvable:$true] %s3748_s6 }
  0xdd   : > { %s3750_s30 = scalar_lea.hbm %s3749_s6, 1  ;;  %p3755_p8 = scmp.lt.s32.totalorder %s3749_s6, %s5044_s3 }
  0xde   : > { %p3751_p5 = scmp.ne.s32.totalorder %s3749_s6, %s3750_s30  ;;  %p3756_p6 = scmp.lt.s32.totalorder %s3754_s24, %s3750_s30 }
  0xe0   : > { %p3752_p4 = pnand %p3751_p5, %p4455_p11  ;;  %p3757_p1 = por %p3756_p6, %p3755_p8 }
  0xe2   : > { %p3753_p9 = pneg %p3752_p4 }
  0xe4   : > { %p3758_p10 = pnand %p3757_p1, %p3753_p9 }
  0xe6   : > { %3761 = shalt.err (!%p3758_p10)
}
  0xe7   : > { %3267 = dma.hbm_to_vmem [thread:$0]  (%p4455_p11), %s1080_s29, 16, %s1082_s23, %s4554_s13  }
  0xe8   : > { %s4993_s9 = sshll.u32 %s4552_s27, 4  ;;  %s4996_s0 = sshll.u32 %s4130_s15, 4 }
  0xe9   : > { %s1097_s10 = scalar_lea.hbm %s5041_s8, %s4996_s0  ;;  %s1092_s7 = scalar_lea.vmem [#allocation12], %s4993_s9 }
  0xea   : > { %s1098_s1 = sshll.u32 %s1097_s10, 4  ;;  %s1100_s28 = sshll.u32 %s1092_s7, 4  ;;  %s1099_s1 = int_to_ptr.hbm [resolvable:$true] %s1098_s1  ;;  %s1101_s28 = int_to_ptr.vmem [resolvable:$true] %s1100_s28 }
  0xeb   : > { %s3776_s26 = sshra.s32 %s1099_s1, 4  ;;  %s3782_s30 = scalar_lea.hbm %s5041_s8, 32  ;;  %s3777_s26 = int_to_ptr.hbm [resolvable:$true] %s3776_s26 }
  0xec   : > { %s3778_s6 = scalar_lea.hbm %s3777_s26, 16  ;;  %p3783_p2 = scmp.lt.s32.totalorder %s3777_s26, %s5041_s8 }
  0xed   : > { %p3779_p12 = scmp.ne.s32.totalorder %s3777_s26, %s3778_s6  ;;  %p3784_p5 = scmp.lt.s32.totalorder %s3782_s30, %s3778_s6 }
  0xef   : > { %p3780_p13 = pnand %p3779_p12, %p4455_p11  ;;  %p3785_p4 = por %p3784_p5, %p3783_p2 }
  0xf1   : > { %p3781_p0 = pneg %p3780_p13 }
  0xf3   : > { %p3786_p9 = pnand %p3785_p4, %p3781_p0 }
  0xf5   : > { %3789 = shalt.err (!%p3786_p9)
}
  0xf6   : > { %s4994_s29 = smov 64   ;;  %s4995_s23 = smov 4  }
  0xf7   : > { %3268 = dma.hbm_to_vmem [thread:$0]  (%p4455_p11), %s1099_s1, 256, %s1101_s28, %s4554_s13, %s4994_s29, %s4994_s29, %s4995_s23  }
  0xf8   : > { %s1116_s24 = scalar_lea.hbm %s5039_s14, %s4130_s15  ;;  %s1113_s7 = scalar_lea.vmem [#allocation13], %s4552_s27 }
  0xf9   : > { %s1118_s10 = sshll.u32 %s1116_s24, 4  ;;  %s1120_s26 = sshll.u32 %s1113_s7, 4  ;;  %s1119_s10 = int_to_ptr.hbm [resolvable:$true] %s1118_s10  ;;  %s1121_s26 = int_to_ptr.vmem [resolvable:$true] %s1120_s26 }
  0xfa   : > { %s3804_s6 = sshra.s32 %s1119_s10, 4  ;;  %s3810_s9 = scalar_lea.hbm %s5039_s14, 2  ;;  %s3805_s6 = int_to_ptr.hbm [resolvable:$true] %s3804_s6 }
  0xfb   : > { %s3806_s30 = scalar_lea.hbm %s3805_s6, 1  ;;  %p3811_p10 = scmp.lt.s32.totalorder %s3805_s6, %s5039_s14 }
  0xfc   : > { %p3807_p8 = scmp.ne.s32.totalorder %s3805_s6, %s3806_s30  ;;  %p3812_p12 = scmp.lt.s32.totalorder %s3810_s9, %s3806_s30 }
  0xfe   : > { %p3808_p6 = pnand %p3807_p8, %p4455_p11  ;;  %p3813_p13 = por %p3812_p12, %p3811_p10 }
 0x100   : > { %p3809_p1 = pneg %p3808_p6 }
 0x102   : > { %p3814_p0 = pnand %p3813_p13, %p3809_p1 }
 0x104   : > { %3817 = shalt.err (!%p3814_p0)
}
 0x105   : > { %3269 = dma.hbm_to_vmem [thread:$0]  (%p4455_p11), %s1119_s10, 16, %s1121_s26, %s4554_s13  }
 0x106   : > { %s1133_s1 = scalar_lea.hbm %s4246_s19, %s4130_s15  ;;  %s1130_s24 = scalar_lea.vmem [#allocation14], %s4552_s27 }
 0x107   : > { %s1135_s28 = sshll.u32 %s1133_s1, 4  ;;  %s1137_s7 = sshll.u32 %s1130_s24, 4  ;;  %s1136_s28 = int_to_ptr.hbm [resolvable:$true] %s1135_s28  ;;  %s1138_s7 = int_to_ptr.vmem [resolvable:$true] %s1137_s7 }
 0x108   : > { %s3832_s9 = sshra.s32 %s1136_s28, 4  ;;  %s3838_s30 = scalar_lea.hbm %s4246_s19, 2  ;;  %s3833_s9 = int_to_ptr.hbm [resolvable:$true] %s3832_s9 }
 0x109   : > { %s3834_s6 = scalar_lea.hbm %s3833_s9, 1  ;;  %p3839_p9 = scmp.lt.s32.totalorder %s3833_s9, %s4246_s19 }
 0x10a   : > { %p3835_p2 = scmp.ne.s32.totalorder %s3833_s9, %s3834_s6  ;;  %p3840_p8 = scmp.lt.s32.totalorder %s3838_s30, %s3834_s6 }
 0x10c   : > { %p3836_p5 = pnand %p3835_p2, %p4455_p11  ;;  %p3841_p6 = por %p3840_p8, %p3839_p9 }
 0x10e   : > { %p3837_p4 = pneg %p3836_p5 }
 0x110   : > { %p3842_p1 = pnand %p3841_p6, %p3837_p4 }
 0x112   : > { %3845 = shalt.err (!%p3842_p1)
}
 0x113   : > { %s5067_s10 = sld [smem:[#allocation42_spill]]  ;;  %s1147_s29 = scalar_lea.vmem [#allocation15], %s4552_s27 }
 0x114   : > { %3270 = dma.hbm_to_vmem [thread:$0]  (%p4455_p11), %s1136_s28, 16, %s1138_s7, %s4554_s13  }
 0x115   : > { %s1154_s23 = sshll.u32 %s1147_s29, 4  ;;  %s1155_s23 = int_to_ptr.vmem [resolvable:$true] %s1154_s23 }
 0x119   : > { %s5068_s26 = smov %s5067_s10  ;;  %s1150_s1 = scalar_lea.hbm %s5067_s10, %s4130_s15 }
 0x11a   : > { %s1152_s24 = sshll.u32 %s1150_s1, 4  ;;  %s3866_s30 = scalar_lea.hbm %s5068_s26, 2  ;;  %s1153_s24 = int_to_ptr.hbm [resolvable:$true] %s1152_s24 }
 0x11b   : > { %s3860_s9 = sshra.s32 %s1153_s24, 4  ;;  %s3861_s9 = int_to_ptr.hbm [resolvable:$true] %s3860_s9 }
 0x11c   : > { %s3862_s6 = scalar_lea.hbm %s3861_s9, 1  ;;  %p3867_p0 = scmp.lt.s32.totalorder %s3861_s9, %s5068_s26 }
 0x11d   : > { %p3863_p10 = scmp.ne.s32.totalorder %s3861_s9, %s3862_s6  ;;  %p3868_p2 = scmp.lt.s32.totalorder %s3866_s30, %s3862_s6 }
 0x11f   : > { %p3864_p12 = pnand %p3863_p10, %p4455_p11  ;;  %p3869_p5 = por %p3868_p2, %p3867_p0 }
 0x121   : > { %p3865_p13 = pneg %p3864_p12 }
 0x123   : > { %p3870_p4 = pnand %p3869_p5, %p3865_p13 }
 0x125   : > { %3873 = shalt.err (!%p3870_p4)
}
 0x126   : > { %s5069_s29 = sld [smem:[#allocation43_spill]]  ;;  %s5071_s28 = sshll.u32 %s4130_s15, 4 }
 0x127   : > { %3271 = dma.hbm_to_vmem [thread:$0]  (%p4455_p11), %s1153_s24, 16, %s1155_s23, %s4554_s13  }
 0x128   : > { %s5072_s1 = sshll.u32 %s4552_s27, 4 }
 0x129   : > { %s1165_s3 = scalar_lea.vmem [#allocation16], %s5072_s1 }
 0x12a   : > { %s1173_s9 = sshll.u32 %s1165_s3, 4  ;;  %s1174_s9 = int_to_ptr.vmem [resolvable:$true] %s1173_s9 }
 0x12c   : > { %s5070_s0 = smov %s5069_s29  ;;  %s1170_s7 = scalar_lea.hbm %s5069_s29, %s5071_s28 }
 0x12d   : > { %s1171_s10 = sshll.u32 %s1170_s7, 4  ;;  %s3894_s4 = scalar_lea.hbm %s5070_s0, 32  ;;  %s1172_s10 = int_to_ptr.hbm [resolvable:$true] %s1171_s10 }
 0x12e   : > { %s3888_s6 = sshra.s32 %s1172_s10, 4  ;;  %s3889_s6 = int_to_ptr.hbm [resolvable:$true] %s3888_s6 }
 0x12f   : > { %s3890_s30 = scalar_lea.hbm %s3889_s6, 16  ;;  %p3895_p1 = scmp.lt.s32.totalorder %s3889_s6, %s5070_s0 }
 0x130   : > { %p3891_p9 = scmp.ne.s32.totalorder %s3889_s6, %s3890_s30  ;;  %p3896_p10 = scmp.lt.s32.totalorder %s3894_s4, %s3890_s30 }
 0x132   : > { %p3892_p8 = pnand %p3891_p9, %p4455_p11  ;;  %p3897_p12 = por %p3896_p10, %p3895_p1 }
 0x134   : > { %p3893_p6 = pneg %p3892_p8 }
 0x136   : > { %p3898_p13 = pnand %p3897_p12, %p3893_p6 }
 0x138   : > { %3901 = shalt.err (!%p3898_p13)
}
 0x139   : > { %s5073_s23 = smov 4   ;;  %s5074_s24 = smov 64  }
 0x13a   : > { %s5075_s3 = sld [smem:[#allocation44_spill]]  ;;  %s1186_s7 = scalar_lea.vmem [#allocation17], %s4552_s27 }
 0x13b   : > { %3272 = dma.hbm_to_vmem [thread:$0]  (%p4455_p11), %s1172_s10, 256, %s1174_s9, %s4554_s13, %s5074_s24, %s5074_s24, %s5073_s23  }
 0x13c   : > { %s1193_s4 = sshll.u32 %s1186_s7, 4  ;;  %s1194_s4 = int_to_ptr.vmem [resolvable:$true] %s1193_s4 }
 0x140   : > { %s1189_s29 = scalar_lea.hbm %s5075_s3, %s4130_s15  ;;  %s3922_s30 = scalar_lea.hbm %s5075_s3, 2 }
 0x141   : > { %s1191_s28 = sshll.u32 %s1189_s29, 4  ;;  %s1192_s28 = int_to_ptr.hbm [resolvable:$true] %s1191_s28 }
 0x142   : > { %s3916_s1 = sshra.s32 %s1192_s28, 4  ;;  %s3917_s1 = int_to_ptr.hbm [resolvable:$true] %s3916_s1 }
 0x143   : > { %s3918_s6 = scalar_lea.hbm %s3917_s1, 1  ;;  %p3923_p4 = scmp.lt.s32.totalorder %s3917_s1, %s5075_s3 }
 0x144   : > { %p3919_p0 = scmp.ne.s32.totalorder %s3917_s1, %s3918_s6  ;;  %p3924_p9 = scmp.lt.s32.totalorder %s3922_s30, %s3918_s6 }
 0x146   : > { %p3920_p2 = pnand %p3919_p0, %p4455_p11  ;;  %p3925_p8 = por %p3924_p9, %p3923_p4 }
 0x148   : > { %p3921_p5 = pneg %p3920_p2 }
 0x14a   : > { %p3926_p6 = pnand %p3925_p8, %p3921_p5 }
 0x14c   : > { %3929 = shalt.err (!%p3926_p6)
}
 0x14d   : > { %s5076_s10 = sld [smem:[#allocation46_spill]]  ;;  %s1211_s29 = scalar_lea.vmem [#allocation18], %s4552_s27 }
 0x14e   : > { %3273 = dma.hbm_to_vmem [thread:$0]  (%p4455_p11), %s1192_s28, 16, %s1194_s4, %s4554_s13  }
 0x14f   : > { %s1218_s7 = sshll.u32 %s1211_s29, 4  ;;  %s1219_s7 = int_to_ptr.vmem [resolvable:$true] %s1218_s7 }
 0x153   : > { %s5077_s9 = smov %s5076_s10  ;;  %s1214_s23 = scalar_lea.hbm %s5076_s10, %s4130_s15 }
 0x154   : > { %s1216_s24 = sshll.u32 %s1214_s23, 4  ;;  %s3950_s30 = scalar_lea.hbm %s5077_s9, 2  ;;  %s1217_s24 = int_to_ptr.hbm [resolvable:$true] %s1216_s24 }
 0x155   : > { %s3944_s1 = sshra.s32 %s1217_s24, 4  ;;  %s3945_s1 = int_to_ptr.hbm [resolvable:$true] %s3944_s1 }
 0x156   : > { %s3946_s6 = scalar_lea.hbm %s3945_s1, 1  ;;  %p3951_p13 = scmp.lt.s32.totalorder %s3945_s1, %s5077_s9 }
 0x157   : > { %p3947_p1 = scmp.ne.s32.totalorder %s3945_s1, %s3946_s6  ;;  %p3952_p0 = scmp.lt.s32.totalorder %s3950_s30, %s3946_s6 }
 0x159   : > { %p3948_p10 = pnand %p3947_p1, %p4455_p11  ;;  %p3953_p2 = por %p3952_p0, %p3951_p13 }
 0x15b   : > { %p3949_p12 = pneg %p3948_p10 }
 0x15d   : > { %p3954_p5 = pnand %p3953_p2, %p3949_p12 }
 0x15f   : > { %3957 = shalt.err (!%p3954_p5)
}
 0x160   : > { %s5078_s28 = sld [smem:[#allocation47_spill]]  ;;  %s1228_s29 = scalar_lea.vmem [#allocation19], %s4552_s27 }
 0x161   : > { %3274 = dma.hbm_to_vmem [thread:$0]  (%p4455_p11), %s1217_s24, 16, %s1219_s7, %s4554_s13  }
 0x162   : > { %s1235_s0 = sshll.u32 %s1228_s29, 4  ;;  %s1236_s0 = int_to_ptr.vmem [resolvable:$true] %s1235_s0 }
 0x166   : > { %s5079_s4 = smov %s5078_s28  ;;  %s1231_s10 = scalar_lea.hbm %s5078_s28, %s4130_s15 }
 0x167   : > { %s1233_s23 = sshll.u32 %s1231_s10, 4  ;;  %s3978_s30 = scalar_lea.hbm %s5079_s4, 2  ;;  %s1234_s23 = int_to_ptr.hbm [resolvable:$true] %s1233_s23 }
 0x168   : > { %s3972_s1 = sshra.s32 %s1234_s23, 4  ;;  %s3973_s1 = int_to_ptr.hbm [resolvable:$true] %s3972_s1 }
 0x169   : > { %s3974_s6 = scalar_lea.hbm %s3973_s1, 1  ;;  %p3979_p6 = scmp.lt.s32.totalorder %s3973_s1, %s5079_s4 }
 0x16a   : > { %p3975_p4 = scmp.ne.s32.totalorder %s3973_s1, %s3974_s6  ;;  %p3980_p1 = scmp.lt.s32.totalorder %s3978_s30, %s3974_s6 }
 0x16c   : > { %p3976_p9 = pnand %p3975_p4, %p4455_p11  ;;  %p3981_p10 = por %p3980_p1, %p3979_p6 }
 0x16e   : > { %p3977_p8 = pneg %p3976_p9 }
 0x170   : > { %p3982_p12 = pnand %p3981_p10, %p3977_p8 }
 0x172   : > { %3985 = shalt.err (!%p3982_p12)
}
 0x173   : > { %s5080_s24 = sld [smem:[#allocation48_spill]]  ;;  %s1245_s10 = scalar_lea.vmem [#allocation20], %s4552_s27 }
 0x174   : > { %3275 = dma.hbm_to_vmem [thread:$0]  (%p4455_p11), %s1234_s23, 16, %s1236_s0, %s4554_s13  }
 0x175   : > { %s1252_s29 = sshll.u32 %s1245_s10, 4  ;;  %s1253_s29 = int_to_ptr.vmem [resolvable:$true] %s1252_s29 }
 0x179   : > { %s1248_s7 = scalar_lea.hbm %s5080_s24, %s4130_s15  ;;  %s4006_s30 = scalar_lea.hbm %s5080_s24, 2 }
 0x17a   : > { %s1250_s28 = sshll.u32 %s1248_s7, 4  ;;  %s1251_s28 = int_to_ptr.hbm [resolvable:$true] %s1250_s28 }
 0x17b   : > { %s4000_s1 = sshra.s32 %s1251_s28, 4  ;;  %s4001_s1 = int_to_ptr.hbm [resolvable:$true] %s4000_s1 }
 0x17c   : > { %s4002_s6 = scalar_lea.hbm %s4001_s1, 1  ;;  %p4007_p5 = scmp.lt.s32.totalorder %s4001_s1, %s5080_s24 }
 0x17d   : > { %p4003_p13 = scmp.ne.s32.totalorder %s4001_s1, %s4002_s6  ;;  %p4008_p4 = scmp.lt.s32.totalorder %s4006_s30, %s4002_s6 }
 0x17f   : > { %p4004_p0 = pnand %p4003_p13, %p4455_p11  ;;  %p4009_p9 = por %p4008_p4, %p4007_p5 }
 0x181   : > { %p4005_p2 = pneg %p4004_p0 }
 0x183   : > { %p4010_p8 = pnand %p4009_p9, %p4005_p2 }
 0x185   : > { %4013 = shalt.err (!%p4010_p8)
}
 0x186   : > { %3276 = dma.hbm_to_vmem [thread:$0]  (%p4455_p11), %s1251_s28, 16, %s1253_s29, %s4554_s13  }
 0x187 PF: > { %1261 = sbr.rel (%p4469_p3) target bundleno = 3659 (0xe4b), region = 148  ;;  %s5082_s0 = sadd.s32 (!%p4469_p3), 4294967295, %s4138_s18  }
 0x188   : > { %s5083_s23 = sld [smem:[#allocation62_spill]] (!%p4469_p3)  ;;  %s1263_s10 = sand.u32 (!%p4469_p3), 1, %s5082_s0  }
 0x189   : > { %s1264_s1 = scalar_lea.sflag (!%p4469_p3), [#allocation6], %s1263_s10 }
 0x18e   : > { %s1265_s3 = sand.u32 1, %s5083_s23  }
 0x18f   : > { %s4700_s4 = sshll.u32 %s1265_s3, 3 }
 0x190   : > { %4073 = dma.done.wait (%p4438_p7), %s1264_s1, 128  }
 0x191   : > { %4075 = vsyncadd (%p4438_p7), %s1264_s1, 4294967168  ;;  %s5085_s22 = sld [smem:[#allocation66_spill]] }
 0x197   : > { %p5086_p11 = scmp.ne.s32.totalorder %s5085_s22, 0 }
 0x199   : > { %4077 = dma.done.wait (%p5086_p11), [#allocation8], 128  }
 0x19a   : > { %4079 = vsyncadd (%p5086_p11), [#allocation8], 4294967168  ;;  %s5087_s13 = sld [smem:[#allocation61_spill]] }
 0x19b   : > { %s5088_s28 = sld [smem:[#allocation71_spill]] }
 0x1a0   : > { %s4712_s29 = sand.u32 1, %s5087_s13  }
 0x1a1   : > { %p5089_p3 = scmp.ne.s32.totalorder %s5088_s28, 0 }
 0x1a3   : > { %4081 = dma.done.wait (%p5089_p3), %s1264_s1, 672  }
 0x1a4   : > { %4083 = vsyncadd (%p5089_p3), %s1264_s1, 4294966624  ;;  %s3097_s30 = sshll.u32 %s4712_s29, 4 }
 0x1a5   : > { %s4722_s23 = scalar_lea.vmem [#allocation12], %s3097_s30  ;;  %s4727_s1 = scalar_lea.vmem [#allocation16], %s3097_s30 }
 0x1a6   : > { %4085 = dma.done.wait (%p5086_p11), [#allocation8], 256  }
 0x1a7   : > { %4087 = vsyncadd (%p5086_p11), [#allocation8], 4294967040 }
 0x1a8   : > { %4089 = dma.done.wait (%p5086_p11), [#allocation23], 512  }
 0x1a9   : > { %4091 = vsyncadd (%p5086_p11), [#allocation23], 4294966784 }
 0x1aa   : > { %4093 = dma.done.wait (%p5086_p11), [#allocation26], 256  }
 0x1ab   : > { %4095 = vsyncadd (%p5086_p11), [#allocation26], 4294967040  ;;  %s5090_s30 = sld [smem:[#allocation63_spill]] }
 0x1ac   : > { %s5091_s6 = sld [smem:[#allocation64_spill]] }
 0x1ad   : > { %s5092_s5 = sld [smem:[#allocation35_spill]] }
 0x1ae   : > { %s5093_s3 = sld [smem:[#allocation37_spill]] }
 0x1af   : > { %s5094_s28 = sld [smem:[#allocation38_spill]] }
 0x1b0   : > { %s5095_s13 = sld [smem:[#allocation45_spill]] }
 0x1b1   : > { %s5096_s10 = sld [smem:[#allocation60_spill]]  ;;  %p1552_p7 = scmp.lt.s32.totalorder %s5090_s30, 1 }
 0x1b2   : > { %p1572_p6 = scmp.lt.s32.totalorder %s5091_s6, 1  ;;  %p3111_p1 = scmp.ne.s32.totalorder %s5090_s30, 0 }
 0x1b3   : > { %s1553_s7 = scalar_select %p1552_p7, %s5090_s30, 1 }
 0x1b4   : > { %s5141_s6 = smov (!%p1572_p6, %s5091_s6), 1  ;;  %1579 = sbr.rel (%p3111_p1) target bundleno = 446 (0x1be), region = 224 }
 0x1b5   : > { %s3230_s0 = sshll.u32 %s1553_s7, 4  ;;  %s3233_s27 = sshll.u32 %s1553_s7, 5 }
 0x1b6   : > { %s1556_s8 = scalar_lea.vmem %s5092_s5, %s3230_s0  ;;  %s1561_s22 = scalar_lea.vmem %s5093_s3, %s3230_s0 }
 0x1b7   : > { %s4754_s9 = scalar_lea.vmem %s5094_s28, %s3230_s0  ;;  %s4757_s12 = scalar_lea.vmem %s5095_s13, %s3233_s27 }
 0x1b8   : > { %s1574_s14 = scalar_lea.vmem %s5096_s10, %s5141_s6  ;;  %s5097_s17 = scalar_lea.vmem (!%p3111_p1), [#allocation5], %s4700_s4 }
 0x1b9   : > { %v1580_v1 = vld [vmem:[%s5097_s17] sm:$0xff]  ;;  %v1581_v2 = vld [vmem:[#allocation7] sm:$0xff]  ;;  %vm1583_vm0 = vcmask 261120   ;;  %vm1585_vm1 = vcmask 261127  }
 0x1ba   : > { %v1582_v3 = vadd.f32 %v1581_v2, %v1580_v1 }
 0x1bc   : > { %1584 = vst.msk [vmem:[#allocation2] sm:$0xff] %vm1583_vm0, %v1582_v3 }
 0x1bd   : > { %1586 = vst.msk [vmem:[#allocation3 - $0x7] sm:$0x80] %vm1585_vm1, %v1582_v3 }
 0x1be PF: > { %v3237_v4 = vld [vmem:[%s1561_s22 + $0x8] sm:$0xff]  ;;  %v3236_v5 = vld [vmem:[%s1561_s22] sm:$0xff]  ;;  %vm1642_vm2 = vcmask 261120   ;;  %s5098_s5 = scalar_lea.vmem [#allocation10], %s4712_s29  ;;  %s5099_s17 = scalar_lea.vmem [#allocation9], %s4712_s29  ;;  %vm1739_vm3 = vcmask 64512  }
 0x1bf   : > { %v3235_v7 = vld [vmem:[%s1556_s8 + $0x8] sm:$0xff]  ;;  %1680 = vmatpush.bf16.msra.mxu1 %v3237_v4  ;;  %v3234_v8 = vld [vmem:[%s1556_s8] sm:$0xff]  ;;  %s4181_s8 = smov 120   ;;  %s4182_s4 = smov 104   ;;  %vm1867_vm4 = vcmask 1043456   ;;  %vm2131_vm9 = vcmask 523264  }
 0x1c0   : > { %1652 = vmatpush.bf16.msra.mxu0 %v3235_v7  ;;  %v3239_v10 = vld [vmem:[%s4754_s9 + $0x8] sm:$0xff]  ;;  %v3462_v11 = vld [vmem:[%s5098_s5] ss:$0 sm:$0xff]  ;;  %s4183_s3 = smov 112   ;;  %s5101_s27 = scalar_lea.vmem [#allocation13], %s4712_s29 }
 0x1c1   : > { %1708 = vmatpush.bf16.msra.mxu2 %v3239_v10  ;;  %v3463_v12 = vld [vmem:[%s5099_s17] ss:$0 sm:$0xff]  ;;  %s5102_s0 = scalar_lea.vmem [#allocation14], %s4712_s29  ;;  %s5104_s7 = scalar_lea.vmem [#allocation17], %s4712_s29 }
 0x1c2   : > { %v3238_v22 = vld [vmem:[%s4754_s9] sm:$0xff]  ;;  %s5100_s9 = scalar_lea.vmem [#allocation11], %s4712_s29  ;;  %s5105_s10 = scalar_lea.vmem [#allocation18], %s4712_s29 }
 0x1c3   : > { %v4764_v6 = vld [vmem:[#allocation2] sm:$0xff]  ;;  %1681 = vmatpush.bf16.msra.mxu1 %v3236_v5  ;;  %s5107_s13 = scalar_lea.vmem [#allocation20], %s4712_s29 }
 0x1c4   : > { %v1626_v9 = vpack.c.bf16 %v4764_v6, %v4764_v6  ;;  %1653 = vmatpush.bf16.msra.mxu0 %v3234_v8  ;;  %v3464_v37 = vld [vmem:[%s5100_s9] ss:$0 sm:$0xff] }
 0x1c5   : > { %1709 = vmatpush.bf16.msra.mxu2 %v3238_v22 }
 0x1c6   : > { %3129 = vmatmul.msk.bf16.vlgmr.msra.gmra.mxu1 %vm1642_vm2, %v1626_v9 }
 0x1c7   : > { %3120 = vmatmul.msk.bf16.vlgmr.msra.gmra.mxu0 %vm1642_vm2, %v1626_v9 }
 0x1c8   : > { %3138 = vmatmul.msk.bf16.vlgmr.msra.gmra.mxu2 %vm1642_vm2, %v1626_v9 }
 0x243   : > { %v1683_v13 = vpop.f32.mrf.mxu1 }
 0x244   : > { %v1684_v14 = vadd.f32 %v3462_v11, %v1683_v13  ;;  %v1655_v15 = vpop.f32.mrf.mxu0  ;;  %v1602_v13 = vld [vmem:[%s4722_s23] sm:$0xf] }
 0x245   : > { %v1656_v16 = vadd.f32 %v3463_v12, %v1655_v15 }
 0x246   : > { %v1723_v17 = vpack.c.bf16 %v1684_v14, %v1684_v14  ;;  %v1949_v14 = vsel %vm1867_vm4, %v1602_v13, 0 }
 0x247   : > { %v1715_v18 = vpack.c.bf16 %v1656_v16, %v1656_v16 }
 0x248   : > { %1725 = vrot.lane.b32.xlu1 %v1723_v17, %s4181_s8  ;;  %1729 = vrot.lane.b32.xlu0 %v1723_v17, %s4182_s4  ;;  %v1744_v19 = vsel %vm1739_vm3, %v1723_v17, 0 }
 0x249   : > { %1753 = vmatpush.bf16.xpose.msra.mxu3 %v1744_v19  ;;  %1717 = vrot.lane.b32.xlu2 %v1715_v18, %s4181_s8 }
 0x24b   : > { %v1685_v20 = vpop.f32.mrf.mxu1  ;;  %v1711_v35 = vpop.f32.mrf.mxu2 }
 0x24c   : > { %v1657_v21 = vpop.f32.mrf.mxu0  ;;  %v1712_v38 = vadd.f32 %v3464_v37, %v1711_v35 }
 0x24e   : > { %v1731_v39 = vpack.c.bf16 %v1712_v38, %v1712_v38  ;;  %v1604_v38 = vld [vmem:[%s4722_s23 + $0x8] sm:$0xf] }
 0x250   : > { %1727 = vrot.lane.b32.xlu1 %v1723_v17, %s4183_s3  ;;  %1721 = vrot.lane.b32.xlu0 %v1715_v18, %s4182_s4  ;;  %v1869_v40 = vsel %vm1867_vm4, %v1731_v39, 0 }
 0x251   : > { %3139 = vmatmul.msk.bf16.vlgmr.msra.gmra.mxu3 %vm1739_vm3, %v1715_v18  ;;  %1719 = vrot.lane.b32.xlu2 %v1715_v18, %s4183_s3 }
 0x252   : > { %1878 = vmatpush.bf16.msrb.mxu3 %v1869_v40 }
 0x253   : > { %v1713_v36 = vpop.f32.mrf.mxu2 }
 0x254   : > { %v1605_v36 = vld [vmem:[%s4722_s23 + $0xc] sm:$0xf] }
 0x255   : > { %v2006_v37 = vsel %vm1867_vm4, %v1605_v36, 0  ;;  %v3243_v36 = vld [vmem:[%s4757_s12 + $0x8] sm:$0xff] }
 0x256   : > { %1958 = vmatpush.bf16.msra.mxu3 %v1949_v14 }
 0x2a3   : > { %v1718_v27 = vpop.permute.xlu2 %1717 }
 0x2ab   : > { %v1720_v31 = vpop.permute.xlu2 %1719 }
 0x2ba   : > { %v1726_v23 = vpop.permute.xlu1 %1725  ;;  %v1730_v24 = vpop.permute.xlu0 %1729 }
 0x2bb   : > { %v1763_v25 = vsel %vm1739_vm3, %v1726_v23, 0  ;;  %v1801_v26 = vsel %vm1739_vm3, %v1730_v24, 0 }
 0x2bc   : > { %1772 = vmatpush.bf16.xpose.msrb.mxu0 %v1763_v25  ;;  %1810 = vmatpush.bf16.xpose.msrb.mxu2 %v1801_v26 }
 0x2c2   : > { %v1728_v28 = vpop.permute.xlu1 %1727  ;;  %v1722_v29 = vpop.permute.xlu0 %1721 }
 0x2c3   : > { %3140 = vmatmul.msk.bf16.vlgmr.msrb.gmra.mxu0 %vm1739_vm3, %v1718_v27  ;;  %3142 = vmatmul.msk.bf16.vlgmr.msrb.gmra.mxu2 %vm1739_vm3, %v1722_v29  ;;  %v1782_v30 = vsel %vm1739_vm3, %v1728_v28, 0 }
 0x2c4   : > { %1791 = vmatpush.bf16.xpose.msrb.mxu1 %v1782_v30 }
 0x2cb   : > { %3141 = vmatmul.msk.bf16.vlgmr.msrb.gmra.mxu1 %vm1739_vm3, %v1720_v31 }
 0x2d4   : > { %v1755_v32 = vpop.f32.mrf.mxu3 }
 0x2d5   : > { %v1816_v33 = vsel %vm1739_vm3, %v1755_v32, -inf }
 0x2d6   : > { %1817 = vmax.xlane.f32.xlu0 %v1816_v33 }
 0x2dc   : > { %v1757_v34 = vpop.f32.mrf.mxu3 }
 0x2dd   : > { %v1603_v34 = vld [vmem:[%s4722_s23 + $0x4] sm:$0xf]  ;;  %s5103_s23 = scalar_lea.vmem [#allocation15], %s4712_s29 }
 0x2de   : > { %v1968_v35 = vsel %vm1867_vm4, %v1603_v34, 0 }
 0x340   : > { %v1774_v41 = vpop.f32.mrf.mxu0 }
 0x341   : > { %v1819_v42 = vsel %vm1739_vm3, %v1774_v41, -inf }
 0x342   : > { %1820 = vmax.xlane.f32.xlu2 %v1819_v42 }
 0x346   : > { %v1812_v43 = vpop.f32.mrf.mxu2 }
 0x347   : > { %v1825_v44 = vsel %vm1739_vm3, %v1812_v43, -inf }
 0x348   : > { %v1776_v45 = vpop.f32.mrf.mxu0  ;;  %v1793_v46 = vpop.f32.mrf.mxu1  ;;  %1826 = vmax.xlane.f32.xlu1 %v1825_v44 }
 0x349   : > { %v1818_v47 = vpop.xlane.xlu0 %1817  ;;  %v1822_v48 = vsel %vm1739_vm3, %v1793_v46, -inf }
 0x34a   : > { %v1828_v49 = vsub.f32 %v1755_v32, %v1818_v47  ;;  %1823 = vmax.xlane.f32.xlu2 %v1822_v48 }
 0x34c   : > { %v1832_v50 = vmul.f32 1.442695, %v1828_v49 }
 0x34e   : > { %3472 = vpow2.f32 %v1832_v50  ;;  %v1814_v51 = vpop.f32.mrf.mxu2 }
 0x350   : > { %v1795_v52 = vpop.f32.mrf.mxu1 }
 0x354   : > { %v3473_v53 = vpop.eup %3472 }
 0x355   : > { %v1840_v54 = vsel %vm1739_vm3, %v3473_v53, 0.0 }
 0x356   : > { %1841 = vadd.xlane.f32.xlu0 %v1840_v54 }
 0x362   : > { %1737 = vrot.lane.b32.xlu2 %v1731_v39, %s4182_s4 }
 0x3b5   : > { %v1821_v55 = vpop.xlane.xlu2 %1820 }
 0x3b6   : > { %v1829_v56 = vsub.f32 %v1774_v41, %v1821_v55 }
 0x3b8   : > { %v1834_v57 = vmul.f32 1.442695, %v1829_v56 }
 0x3ba   : > { %3474 = vpow2.f32 %v1834_v57 }
 0x3bb   : > { %v1827_v58 = vpop.xlane.xlu1 %1826 }
 0x3bc   : > { %v1831_v62 = vsub.f32 %v1812_v43, %v1827_v58 }
 0x3bd   : > { %v1824_v59 = vpop.xlane.xlu2 %1823 }
 0x3be   : > { %v1830_v60 = vsub.f32 %v1793_v46, %v1824_v59  ;;  %v1838_v1 = vmul.f32 1.442695, %v1831_v62 }
 0x3c0   : > { %v3475_v61 = vpop.eup %3474  ;;  %v1836_v63 = vmul.f32 1.442695, %v1830_v60  ;;  %v3465_v60 = vld [vmem:[%s5101_s27] ss:$0 sm:$0xff] }
 0x3c1   : > { %v1843_v0 = vsel %vm1739_vm3, %v3475_v61, 0.0 }
 0x3c2   : > { %3476 = vpow2.f32 %v1836_v63  ;;  %1844 = vadd.xlane.f32.xlu0 %v1843_v0 }
 0x3c3   : > { %3478 = vpow2.f32 %v1838_v1 }
 0x3c5   : > { %v1738_v2 = vpop.permute.xlu2 %1737 }
 0x3c6   : > { %v1926_v3 = vsel %vm1867_vm4, %v1738_v2, 0 }
 0x3c7   : > { %1935 = vmatpush.bf16.msra.mxu2 %v1926_v3 }
 0x3c8   : > { %v3477_v4 = vpop.eup %3476 }
 0x3c9   : > { %v1842_v5 = vpop.xlane.xlu0 %1841  ;;  %v1846_v7 = vsel %vm1739_vm3, %v3477_v4, 0.0  ;;  %v3479_v8 = vpop.eup %3478 }
 0x3ca   : > { %3480 = vrcp.f32 %v1842_v5  ;;  %1847 = vadd.xlane.f32.xlu1 %v1846_v7  ;;  %v1849_v11 = vsel %vm1739_vm3, %v3479_v8, 0.0 }
 0x3cb   : > { %2015 = vmatpush.bf16.msrb.mxu2 %v2006_v37  ;;  %v3242_v37 = vld [vmem:[%s4757_s12] sm:$0xff] }
 0x3d0   : > { %v3481_v9 = vpop.eup %3480 }
 0x3d1   : > { %v1856_v10 = vmul.f32 %v3481_v9, %v3473_v53 }
 0x3d2   : > { %1850 = vadd.xlane.f32.xlu1 %v1849_v11 }
 0x3d3   : > { %v1860_v12 = vpack.c.bf16 %v1856_v10, %v1856_v10 }
 0x3d5   : > { %3143 = vmatmul.msk.bf16.vlgmr.msrb.gmra.mxu3 %vm1739_vm3, %v1860_v12 }
 0x3d6   : > { %1733 = vrot.lane.b32.xlu0 %v1731_v39, %s4181_s8 }
 0x3eb   : > { %1735 = vrot.lane.b32.xlu1 %v1731_v39, %s4183_s3  ;;  %v1987_v39 = vsel %vm1867_vm4, %v1604_v38, 0  ;;  %v3468_v38 = vld [vmem:[%s5104_s7] ss:$0 sm:$0xff] }
 0x435   : > { %v1845_v15 = vpop.xlane.xlu0 %1844 }
 0x436   : > { %3482 = vrcp.f32 %v1845_v15 }
 0x43c   : > { %v3483_v17 = vpop.eup %3482 }
 0x43d   : > { %v1848_v16 = vpop.xlane.xlu1 %1847  ;;  %v1857_v19 = vmul.f32 %v3483_v17, %v3475_v61  ;;  %v3240_v17 = vld [vmem:[%s4727_s1] sm:$0xff] }
 0x43f   : > { %v1861_v22 = vpack.c.bf16 %v1857_v19, %v1857_v19 }
 0x445   : > { %v1851_v18 = vpop.xlane.xlu1 %1850 }
 0x446   : > { %3484 = vrcp.f32 %v1851_v18  ;;  %v3245_v18 = vld [vmem:[%s4757_s12 + $0x18] sm:$0xff] }
 0x447   : > { %3486 = vrcp.f32 %v1848_v16  ;;  %v3241_v16 = vld [vmem:[%s4727_s1 + $0x8] sm:$0xff]  ;;  %s5108_s1 = sld [smem:[#allocation63_spill]] }
 0x448   : > { %v1734_v20 = vpop.permute.xlu0 %1733  ;;  %2095 = vmatpush.bf16.msrb.mxu3 %v3241_v16 }
 0x449   : > { %v1888_v21 = vsel %vm1867_vm4, %v1734_v20, 0 }
 0x44a   : > { %1897 = vmatpush.bf16.msra.mxu0 %v1888_v21  ;;  %v3244_v21 = vld [vmem:[%s4757_s12 + $0x10] sm:$0xff]  ;;  %s5106_s12 = scalar_lea.vmem [#allocation19], %s4712_s29 }
 0x44c   : > { %v3485_v23 = vpop.eup %3484  ;;  %2096 = vmatpush.bf16.msrb.mxu3 %v3240_v17 }
 0x44d   : > { %v1859_v24 = vmul.f32 %v3485_v23, %v3479_v8  ;;  %3144 = vmatmul.msk.bf16.vlgmr.msra.gmra.mxu0 %vm1739_vm3, %v1861_v22  ;;  %v3487_v27 = vpop.eup %3486  ;;  %p3177_p10 = scmp.ne.s32.totalorder %s5108_s1, 1 }
 0x44e   : > { %v1858_v29 = vmul.f32 %v3487_v27, %v3477_v4  ;;  %1977 = vmatpush.bf16.msrb.mxu0 %v1968_v35  ;;  %v4184_v4 = vmov 32.0   ;;  %s5109_s28 = sld [smem:[#allocation49_spill]] (!%p3177_p10)  ;;  %s4185_s29 = smov (!%p3177_p10), 120  }
 0x44f   : > { %v1863_v25 = vpack.c.bf16 %v1859_v24, %v1859_v24  ;;  %3488 = vrcp.f32 %v4184_v4  ;;  %s5111_s22 = sld [smem:[#allocation51_spill]] (!%p3177_p10)  ;;  %s4186_s17 = smov (!%p3177_p10), 104  }
 0x450   : > { %v1862_v32 = vpack.c.bf16 %v1858_v29, %v1858_v29  ;;  %v3466_v29 = vld [vmem:[%s5102_s0] ss:$0 sm:$0xff]  ;;  %s5112_s5 = sld [smem:[#allocation50_spill]] (!%p3177_p10)  ;;  %s4187_s8 = smov (!%p3177_p10), 112  }
 0x451   : > { %3146 = vmatmul.msk.bf16.vlgmr.msra.gmra.mxu2 %vm1739_vm3, %v1863_v25  ;;  %s5113_s4 = sld [smem:[#allocation53_spill]] (!%p3177_p10) }
 0x452   : > { %2139 = vmatpush.bf16.msra.mxu0 %v3245_v18  ;;  %s5114_s3 = sld [smem:[#allocation55_spill]] (!%p3177_p10) }
 0x453   : > { %s5115_s9 = sld [smem:[#allocation56_spill]] (!%p3177_p10) }
 0x454   : > { %s5110_s30 = smov (!%p3177_p10), %s5109_s28  ;;  %s5116_s27 = sld [smem:[#allocation57_spill]] (!%p3177_p10) }
 0x455   : > { %v3489_v5 = vpop.eup %3488  ;;  %s5117_s0 = sld [smem:[#allocation58_spill]] (!%p3177_p10) }
 0x456   : > { %v2037_v7 = vmul.f32 32.0, %v3489_v5  ;;  %vm2041_vm5 = vweird.f32 %v3489_v5  ;;  %2140 = vmatpush.bf16.msra.mxu0 %v3244_v21 }
 0x458   : > { %v1880_v26 = vpop.f32.mrf.mxu3  ;;  %v2038_v8 = vsub.f32 1.0, %v2037_v7 }
 0x459   : > { %v1941_v28 = vpack.c.bf16 %v1880_v26, %v1880_v26 }
 0x45a   : > { %v2039_v9 = vmul.f32 %v3489_v5, %v2038_v8  ;;  %2141 = vmatpush.bf16.msra.mxu0 %v3243_v36 }
 0x45b   : > { %3147 = vmatmul.msk.bf16.vlgmr.msra.gmra.mxu3 %vm1739_vm3, %v1941_v28 }
 0x45c   : > { %v2040_v10 = vadd.f32 %v3489_v5, %v2039_v9 }
 0x45d   : > { %v1736_v30 = vpop.permute.xlu1 %1735 }
 0x45e   : > { %v1907_v31 = vsel %vm1867_vm4, %v1736_v30, 0  ;;  %v4832_v11 = vsel %vm2041_vm5, %v3489_v5, %v2040_v10  ;;  %2142 = vmatpush.bf16.msra.mxu0 %v3242_v37 }
 0x45f   : > { %1916 = vmatpush.bf16.msra.mxu1 %v1907_v31  ;;  %v3467_v31 = vld [vmem:[%s5103_s23] ss:$0 sm:$0xff]  ;;  %s5118_s23 = sld [smem:[#allocation59_spill]] (!%p3177_p10) }
 0x460   : > { %v1882_v33 = vpop.f32.mrf.mxu3 }
 0x462   : > { %3145 = vmatmul.msk.bf16.vlgmr.msra.gmra.mxu1 %vm1739_vm3, %v1862_v32 }
 0x463   : > { %1996 = vmatpush.bf16.msrb.mxu1 %v1987_v39 }
 0x4ca   : > { %v1899_v40 = vpop.f32.mrf.mxu0 }
 0x4cb   : > { %v1942_v41 = vpack.c.bf16 %v1899_v40, %v1899_v40 }
 0x4cd   : > { %3148 = vmatmul.msk.bf16.vlgmr.msrb.gmra.mxu0 %vm1739_vm3, %v1942_v41 }
 0x4d2   : > { %v1901_v42 = vpop.f32.mrf.mxu0 }
 0x4d4   : > { %v1937_v43 = vpop.f32.mrf.mxu2 }
 0x4d5   : > { %v1944_v44 = vpack.c.bf16 %v1937_v43, %v1937_v43 }
 0x4d7   : > { %3150 = vmatmul.msk.bf16.vlgmr.msrb.gmra.mxu2 %vm1739_vm3, %v1944_v44  ;;  %v3469_v44 = vld [vmem:[%s5105_s10] ss:$0 sm:$0xff] }
 0x4dc   : > { %v1939_v45 = vpop.f32.mrf.mxu2 }
 0x4de   : > { %v1960_v46 = vpop.f32.mrf.mxu3 }
 0x4df   : > { %v1918_v47 = vpop.f32.mrf.mxu1  ;;  %v2021_v55 = vsel %vm1642_vm2, %v1960_v46, 0.0 }
 0x4e0   : > { %v1943_v48 = vpack.c.bf16 %v1918_v47, %v1918_v47 }
 0x4e2   : > { %3149 = vmatmul.msk.bf16.vlgmr.msrb.gmra.mxu1 %vm1739_vm3, %v1943_v48 }
 0x4e6   : > { %v1962_v49 = vpop.f32.mrf.mxu3 }
 0x4e7   : > { %v1920_v50 = vpop.f32.mrf.mxu1 }
 0x54a   : > { %v1979_v51 = vpop.f32.mrf.mxu0 }
 0x54b   : > { %v2022_v54 = vsel %vm1642_vm2, %v1979_v51, 0.0 }
 0x54c   : > { %v2023_v56 = vadd.f32 %v2022_v54, %v2021_v55 }
 0x552   : > { %v1981_v52 = vpop.f32.mrf.mxu0 }
 0x55a   : > { %v2017_v53 = vpop.f32.mrf.mxu2 }
 0x55b   : > { %v2026_v61 = vsel %vm1642_vm2, %v2017_v53, 0.0 }
 0x55f   : > { %v1998_v57 = vpop.f32.mrf.mxu1 }
 0x560   : > { %v2024_v58 = vsel %vm1642_vm2, %v1998_v57, 0.0 }
 0x561   : > { %v2025_v59 = vadd.f32 %v2024_v58, %v2023_v56 }
 0x562   : > { %v2019_v62 = vpop.f32.mrf.mxu2 }
 0x563   : > { %v2027_v63 = vadd.f32 %v2026_v61, %v2025_v59 }
 0x565   : > { %v2031_v0 = vadd.f32 %v3465_v60, %v2027_v63 }
 0x567   : > { %v2000_v1 = vpop.f32.mrf.mxu1  ;;  %v2032_v2 = vadd.f32 %v2031_v0, %v4764_v6  ;;  %v3470_v0 = vld [vmem:[%s5106_s12] ss:$0 sm:$0xff] }
 0x569   : > { %v2033_v3 = vsel %vm1642_vm2, %v2032_v2, 0.0 }
 0x56a   : > { %2034 = vadd.xlane.f32.xlu2 %v2033_v3 }
 0x5dd   : > { %v2035_v12 = vpop.xlane.xlu2 %2034 }
 0x5de   : > { %v2043_v6 = vmul.f32 %v4832_v11, %v2035_v12 }
 0x5e0   : > { %v2044_v13 = vsub.f32 %v2032_v2, %v2043_v6  ;;  %v3471_v2 = vld [vmem:[%s5107_s13] ss:$0 sm:$0xff] }
 0x5e2   : > { %v2045_v14 = vmul.f32 %v2044_v13, %v2044_v13 }
 0x5e4   : > { %v2046_v15 = vsel %vm1642_vm2, %v2045_v14, 0.0 }
 0x5e5   : > { %2047 = vadd.xlane.f32.xlu0 %v2046_v15 }
 0x658   : > { %v2048_v19 = vpop.xlane.xlu0 %2047 }
 0x659   : > { %v2049_v20 = vmul.f32 %v2048_v19, %v4832_v11 }
 0x65b   : > { %v2050_v22 = vadd.f32 1e-05, %v2049_v20 }
 0x65d   : > { %3490 = vrsqrt.f32 %v2050_v22  ;;  %vm2057_vm7 = vweird.f32 %v2050_v22 }
 0x663   : > { %v3491_v23 = vpop.eup %3490 }
 0x664   : > { %v2052_v24 = vmul.f32 %v3491_v23, %v2050_v22  ;;  %vm2058_vm6 = vweird.f32 %v3491_v23 }
 0x665   : > { %vm2059_vm8 = vmor %vm2057_vm7, %vm2058_vm6 }
 0x666   : > { %v2053_v25 = vmul.f32 %v3491_v23, %v2052_v24 }
 0x668   : > { %v2054_v26 = vmul.f32 0.5, %v2053_v25 }
 0x66a   : > { %v2055_v27 = vsub.f32 1.5, %v2054_v26 }
 0x66c   : > { %v2056_v28 = vmul.f32 %v3491_v23, %v2055_v27 }
 0x66e   : > { %v2060_v30 = vsel %vm2059_vm8, %v3491_v23, %v2056_v28 }
 0x66f   : > { %v2061_v32 = vmul.f32 %v2060_v30, %v2044_v13 }
 0x671   : > { %v2065_v33 = vmul.f32 %v3466_v29, %v2061_v32 }
 0x673   : > { %v2069_v34 = vadd.f32 %v3467_v31, %v2065_v33 }
 0x675   : > { %v2070_v35 = vpack.c.bf16 %v2069_v34, %v2069_v34 }
 0x677   : > { %3159 = vmatmul.msk.bf16.vlgmr.msrb.gmra.mxu3 %vm1642_vm2, %v2070_v35 }
 0x6fa   : > { %v2098_v39 = vpop.f32.mrf.mxu3 }
 0x6fb   : > { %v2099_v40 = vadd.f32 %v3468_v38, %v2098_v39 }
 0x6fd   : > { %v2102_v41 = vmax.f32 %v2099_v40, 0.0 }
 0x6ff   : > { %v2103_v42 = vpack.c.bf16 %v2102_v41, %v2102_v41 }
 0x701   : > { %3176 = vmatmul.msk.bf16.vlgmr.msra.gmra.mxu0 %vm2131_vm9, %v2103_v42 }
 0x702   : > { %v2100_v43 = vpop.f32.mrf.mxu3 }
 0x77e   : > { %v2144_v45 = vpop.f32.mrf.mxu0 }
 0x77f   : > { %v2145_v46 = vadd.f32 %v3469_v44, %v2144_v45 }
 0x781   : > { %v2148_v47 = vadd.f32 %v2145_v46, %v2069_v34 }
 0x783   : > { %v2149_v48 = vsel %vm1642_vm2, %v2148_v47, 0.0 }
 0x784   : > { %2150 = vadd.xlane.f32.xlu1 %v2149_v48 }
 0x786   : > { %v2146_v49 = vpop.f32.mrf.mxu0 }
 0x7f7   : > { %v2151_v50 = vpop.xlane.xlu1 %2150 }
 0x7f8   : > { %v2152_v51 = vmul.f32 %v2151_v50, %v4832_v11 }
 0x7fa   : > { %v2153_v52 = vsub.f32 %v2148_v47, %v2152_v51 }
 0x7fc   : > { %v2154_v53 = vmul.f32 %v2153_v52, %v2153_v52 }
 0x7fe   : > { %v2155_v54 = vsel %vm1642_vm2, %v2154_v53, 0.0 }
 0x7ff   : > { %2156 = vadd.xlane.f32.xlu2 %v2155_v54 }
 0x872   : > { %v2157_v55 = vpop.xlane.xlu2 %2156 }
 0x873   : > { %v2158_v56 = vmul.f32 %v2157_v55, %v4832_v11 }
 0x875   : > { %v2159_v57 = vadd.f32 1e-05, %v2158_v56 }
 0x877   : > { %3492 = vrsqrt.f32 %v2159_v57  ;;  %vm2166_vm11 = vweird.f32 %v2159_v57 }
 0x87d   : > { %v3493_v58 = vpop.eup %3492 }
 0x87e   : > { %v2161_v59 = vmul.f32 %v3493_v58, %v2159_v57  ;;  %vm2167_vm10 = vweird.f32 %v3493_v58 }
 0x87f   : > { %vm2168_vm12 = vmor %vm2166_vm11, %vm2167_vm10 }
 0x880   : > { %v2162_v60 = vmul.f32 %v3493_v58, %v2161_v59 }
 0x882   : > { %v2163_v61 = vmul.f32 0.5, %v2162_v60 }
 0x884   : > { %v2164_v62 = vsub.f32 1.5, %v2163_v61 }
 0x886   : > { %v2165_v63 = vmul.f32 %v3493_v58, %v2164_v62 }
 0x888   : > { %v2169_v1 = vsel %vm2168_vm12, %v3493_v58, %v2165_v63 }
 0x889   : > { %v2170_v3 = vmul.f32 %v2169_v1, %v2153_v52 }
 0x88b   : > { %v2174_v4 = vmul.f32 %v3470_v0, %v2170_v3  ;;  %2183 = sbr.rel (%p3177_p10) target bundleno = 3659 (0xe4b), region = 228 }
 0x88d   : > { %v2178_v5 = vadd.f32 %v3471_v2, %v2174_v4 }
 0x88f   : > { %2179 = vst.msk [vmem:[#allocation2] sm:$0xff] %vm1642_vm2, %v2178_v5 }
 0x890   : > { %v3249_v7 = vld [vmem:[#allocation21 + $0x8] sm:$0xff]  ;;  %v3247_v8 = vld [vmem:[%s5109_s28 + $0x8] sm:$0xff]  ;;  %v3248_v9 = vld [vmem:[#allocation21] sm:$0xff]  ;;  %v2243_v6 = vpack.c.bf16 %v2178_v5, %v2178_v5  ;;  %vm2403_vm13 = vcmask 57344   ;;  %vm2608_vm14 = vcmask 253952  }
 0x891   : > { %2268 = vmatpush.bf16.msra.mxu1 %v3249_v7  ;;  %2236 = vmatpush.bf16.msra.mxu0 %v3247_v8  ;;  %v3246_v10 = vld [vmem:[%s5110_s30] sm:$0xff]  ;;  %v4864_v12 = vld [vmem:[#allocation3] sm:$0x1]  ;;  %v3251_v14 = vld [vmem:[#allocation22 + $0x8] sm:$0xff] }
 0x892   : > { %v2214_v13 = vpack.c.bf16 %v4864_v12, %v4864_v12  ;;  %2296 = vmatpush.bf16.msra.mxu2 %v3251_v14  ;;  %v3494_v15 = vld [vmem:[%s5111_s22] ss:$0 sm:$0xff]  ;;  %v3250_v26 = vld [vmem:[#allocation22] sm:$0xff] }
 0x893   : > { %v2188_v16 = vld [vmem:[%s5112_s5] sm:$0x1] }
 0x894   : > { %v3495_v41 = vld [vmem:[%s5113_s4] ss:$0 sm:$0xff] }
 0x895   : > { %2269 = vmatpush.bf16.msra.mxu1 %v3248_v9  ;;  %2237 = vmatpush.bf16.msra.mxu0 %v3246_v10 }
 0x896   : > { %2297 = vmatpush.bf16.msra.mxu2 %v3250_v26 }
 0x898   : > { %3195 = vmatmul.msk.bf16.vlgmr.msra.gmra.mxu1 %vm1642_vm2, %v2243_v6  ;;  %3186 = vmatmul.msk.bf16.vlgmr.msra.gmra.mxu0 %vm1642_vm2, %v2214_v13 }
 0x899   : > { %3204 = vmatmul.msk.bf16.vlgmr.msra.gmra.mxu2 %vm1642_vm2, %v2243_v6 }
 0x915   : > { %v2271_v17 = vpop.f32.mrf.mxu1  ;;  %v2239_v18 = vpop.f32.mrf.mxu0 }
 0x916   : > { %v2272_v19 = vadd.f32 %v3494_v15, %v2271_v17  ;;  %v2240_v20 = vadd.f32 %v2239_v18, %v2188_v16  ;;  %v2199_v18 = vld [vmem:[#allocation24] sm:$0xf] }
 0x918   : > { %v2311_v21 = vpack.c.bf16 %v2272_v19, %v2272_v19  ;;  %v2303_v22 = vpack.c.bf16 %v2240_v20, %v2240_v20  ;;  %v2536_v19 = vsel %vm1867_vm4, %v2199_v18, 0 }
 0x91a   : > { %2313 = vrot.lane.b32.xlu1 %v2311_v21, %s4185_s29  ;;  %2317 = vrot.lane.b32.xlu0 %v2311_v21, %s4186_s17  ;;  %v2331_v23 = vsel %vm1739_vm3, %v2311_v21, 0 }
 0x91b   : > { %2340 = vmatpush.bf16.xpose.msra.mxu3 %v2331_v23  ;;  %2305 = vrot.lane.b32.xlu2 %v2303_v22, %s4185_s29 }
 0x91c   : > { %v2299_v39 = vpop.f32.mrf.mxu2 }
 0x91d   : > { %v2273_v24 = vpop.f32.mrf.mxu1  ;;  %v2241_v25 = vpop.f32.mrf.mxu0  ;;  %v2300_v42 = vadd.f32 %v3495_v41, %v2299_v39  ;;  %v2200_v39 = vld [vmem:[#allocation24 + $0x4] sm:$0xf]  ;;  %v2202_v41 = vld [vmem:[#allocation24 + $0xc] sm:$0xf] }
 0x91f   : > { %v2319_v43 = vpack.c.bf16 %v2300_v42, %v2300_v42  ;;  %v2593_v42 = vsel %vm1867_vm4, %v2202_v41, 0 }
 0x921   : > { %v2456_v44 = vsel %vm1867_vm4, %v2319_v43, 0 }
 0x922   : > { %2315 = vrot.lane.b32.xlu1 %v2311_v21, %s4187_s8  ;;  %2309 = vrot.lane.b32.xlu0 %v2303_v22, %s4186_s17 }
 0x923   : > { %3205 = vmatmul.msk.bf16.vlgmr.msra.gmra.mxu3 %vm1739_vm3, %v2303_v22  ;;  %2307 = vrot.lane.b32.xlu2 %v2303_v22, %s4187_s8 }
 0x924   : > { %v2301_v40 = vpop.f32.mrf.mxu2  ;;  %2465 = vmatpush.bf16.msrb.mxu3 %v2456_v44 }
 0x925   : > { %v2555_v40 = vsel %vm1867_vm4, %v2200_v39, 0 }
 0x928   : > { %2545 = vmatpush.bf16.msra.mxu3 %v2536_v19 }
 0x975   : > { %v2306_v31 = vpop.permute.xlu2 %2305 }
 0x97d   : > { %v2308_v35 = vpop.permute.xlu2 %2307 }
 0x98c   : > { %v2314_v27 = vpop.permute.xlu1 %2313  ;;  %v2318_v28 = vpop.permute.xlu0 %2317 }
 0x98d   : > { %v2350_v29 = vsel %vm1739_vm3, %v2314_v27, 0  ;;  %v2388_v30 = vsel %vm1739_vm3, %v2318_v28, 0 }
 0x98e   : > { %2359 = vmatpush.bf16.xpose.msrb.mxu0 %v2350_v29  ;;  %2397 = vmatpush.bf16.xpose.msrb.mxu2 %v2388_v30 }
 0x994   : > { %v2316_v32 = vpop.permute.xlu1 %2315  ;;  %v2310_v33 = vpop.permute.xlu0 %2309 }
 0x995   : > { %3206 = vmatmul.msk.bf16.vlgmr.msrb.gmra.mxu0 %vm1739_vm3, %v2306_v31  ;;  %3208 = vmatmul.msk.bf16.vlgmr.msrb.gmra.mxu2 %vm1739_vm3, %v2310_v33  ;;  %v2369_v34 = vsel %vm1739_vm3, %v2316_v32, 0 }
 0x996   : > { %2378 = vmatpush.bf16.xpose.msrb.mxu1 %v2369_v34 }
 0x99d   : > { %3207 = vmatmul.msk.bf16.vlgmr.msrb.gmra.mxu1 %vm1739_vm3, %v2308_v35 }
 0x9a6   : > { %v2342_v36 = vpop.f32.mrf.mxu3 }
 0x9a7   : > { %v2404_v37 = vsel %vm2403_vm13, %v2342_v36, -inf }
 0x9a8   : > { %2405 = vmax.xlane.f32.xlu0 %v2404_v37 }
 0x9ae   : > { %v2344_v38 = vpop.f32.mrf.mxu3 }
 0xa12   : > { %v2361_v45 = vpop.f32.mrf.mxu0 }
 0xa13   : > { %v2407_v46 = vsel %vm2403_vm13, %v2361_v45, -inf }
 0xa14   : > { %2408 = vmax.xlane.f32.xlu2 %v2407_v46 }
 0xa18   : > { %v2399_v47 = vpop.f32.mrf.mxu2 }
 0xa19   : > { %v2413_v48 = vsel %vm2403_vm13, %v2399_v47, -inf }
 0xa1a   : > { %v2363_v49 = vpop.f32.mrf.mxu0  ;;  %v2380_v50 = vpop.f32.mrf.mxu1  ;;  %2414 = vmax.xlane.f32.xlu1 %v2413_v48 }
 0xa1b   : > { %v2406_v51 = vpop.xlane.xlu0 %2405  ;;  %v2410_v52 = vsel %vm2403_vm13, %v2380_v50, -inf }
 0xa1c   : > { %v2416_v53 = vsub.f32 %v2342_v36, %v2406_v51  ;;  %2411 = vmax.xlane.f32.xlu2 %v2410_v52 }
 0xa1e   : > { %v2420_v54 = vmul.f32 1.442695, %v2416_v53 }
 0xa20   : > { %3496 = vpow2.f32 %v2420_v54  ;;  %v2401_v55 = vpop.f32.mrf.mxu2 }
 0xa22   : > { %v2382_v56 = vpop.f32.mrf.mxu1 }
 0xa26   : > { %v3497_v57 = vpop.eup %3496 }
 0xa27   : > { %v2428_v58 = vsel %vm2403_vm13, %v3497_v57, 0.0 }
 0xa28   : > { %2429 = vadd.xlane.f32.xlu0 %v2428_v58 }
 0xa34   : > { %2325 = vrot.lane.b32.xlu2 %v2319_v43, %s4186_s17 }
 0xa87   : > { %v2409_v59 = vpop.xlane.xlu2 %2408 }
 0xa88   : > { %v2417_v60 = vsub.f32 %v2361_v45, %v2409_v59 }
 0xa8a   : > { %v2422_v61 = vmul.f32 1.442695, %v2417_v60 }
 0xa8c   : > { %3498 = vpow2.f32 %v2422_v61 }
 0xa8d   : > { %v2415_v62 = vpop.xlane.xlu1 %2414 }
 0xa8e   : > { %v2419_v2 = vsub.f32 %v2399_v47, %v2415_v62 }
 0xa8f   : > { %v2412_v63 = vpop.xlane.xlu2 %2411 }
 0xa90   : > { %v2418_v0 = vsub.f32 %v2380_v50, %v2412_v63  ;;  %v2426_v5 = vmul.f32 1.442695, %v2419_v2 }
 0xa92   : > { %v3499_v1 = vpop.eup %3498  ;;  %v2424_v3 = vmul.f32 1.442695, %v2418_v0 }
 0xa93   : > { %v2431_v4 = vsel %vm2403_vm13, %v3499_v1, 0.0 }
 0xa94   : > { %3500 = vpow2.f32 %v2424_v3  ;;  %2432 = vadd.xlane.f32.xlu0 %v2431_v4  ;;  %v2203_v3 = vld [vmem:[%s5114_s3] sm:$0x1] }
 0xa95   : > { %3502 = vpow2.f32 %v2426_v5 }
 0xa97   : > { %v2326_v7 = vpop.permute.xlu2 %2325 }
 0xa98   : > { %v2513_v8 = vsel %vm1867_vm4, %v2326_v7, 0 }
 0xa99   : > { %2522 = vmatpush.bf16.msra.mxu2 %v2513_v8 }
 0xa9a   : > { %v3501_v9 = vpop.eup %3500 }
 0xa9b   : > { %v2430_v10 = vpop.xlane.xlu0 %2429  ;;  %v2434_v6 = vsel %vm2403_vm13, %v3501_v9, 0.0  ;;  %v3503_v13 = vpop.eup %3502 }
 0xa9c   : > { %3504 = vrcp.f32 %v2430_v10  ;;  %2435 = vadd.xlane.f32.xlu1 %v2434_v6  ;;  %v2437_v15 = vsel %vm2403_vm13, %v3503_v13, 0.0 }
 0xa9d   : > { %2602 = vmatpush.bf16.msrb.mxu2 %v2593_v42 }
 0xaa2   : > { %v3505_v14 = vpop.eup %3504 }
 0xaa3   : > { %v2444_v16 = vmul.f32 %v3505_v14, %v3497_v57 }
 0xaa4   : > { %2438 = vadd.xlane.f32.xlu1 %v2437_v15 }
 0xaa5   : > { %v2448_v17 = vpack.c.bf16 %v2444_v16, %v2444_v16  ;;  %v3253_v16 = vld [vmem:[#allocation25 + $0x8] sm:$0xff] }
 0xaa7   : > { %3209 = vmatmul.msk.bf16.vlgmr.msrb.gmra.mxu3 %vm1739_vm3, %v2448_v17  ;;  %v3252_v17 = vld [vmem:[#allocation25] sm:$0xff] }
 0xaa8   : > { %2321 = vrot.lane.b32.xlu0 %v2319_v43, %s4185_s29  ;;  %2664 = vmatpush.bf16.msrb.mxu3 %v3253_v16 }
 0xaac   : > { %2665 = vmatpush.bf16.msrb.mxu3 %v3252_v17 }
 0xabd   : > { %2323 = vrot.lane.b32.xlu1 %v2319_v43, %s4187_s8  ;;  %v2201_v43 = vld [vmem:[#allocation24 + $0x8] sm:$0xf] }
 0xabe   : > { %v2574_v44 = vsel %vm1867_vm4, %v2201_v43, 0 }
 0xb07   : > { %v2433_v20 = vpop.xlane.xlu0 %2432 }
 0xb08   : > { %3506 = vrcp.f32 %v2433_v20 }
 0xb0e   : > { %v3507_v22 = vpop.eup %3506 }
 0xb0f   : > { %v2436_v21 = vpop.xlane.xlu1 %2435  ;;  %v2445_v24 = vmul.f32 %v3507_v22, %v3499_v1 }
 0xb11   : > { %v2449_v27 = vpack.c.bf16 %v2445_v24, %v2445_v24 }
 0xb17   : > { %v2439_v23 = vpop.xlane.xlu1 %2438 }
 0xb18   : > { %3508 = vrcp.f32 %v2439_v23 }
 0xb19   : > { %3510 = vrcp.f32 %v2436_v21 }
 0xb1a   : > { %v2322_v25 = vpop.permute.xlu0 %2321 }
 0xb1b   : > { %v2475_v26 = vsel %vm1867_vm4, %v2322_v25, 0 }
 0xb1c   : > { %2484 = vmatpush.bf16.msra.mxu0 %v2475_v26 }
 0xb1e   : > { %v3509_v28 = vpop.eup %3508 }
 0xb1f   : > { %v2447_v29 = vmul.f32 %v3509_v28, %v3503_v13  ;;  %3210 = vmatmul.msk.bf16.vlgmr.msra.gmra.mxu0 %vm1739_vm3, %v2449_v27  ;;  %v3511_v32 = vpop.eup %3510  ;;  %v2204_v27 = vld [vmem:[%s5115_s9] sm:$0x1] }
 0xb20   : > { %v2446_v34 = vmul.f32 %v3511_v32, %v3501_v9  ;;  %2564 = vmatpush.bf16.msrb.mxu0 %v2555_v40  ;;  %v2210_v32 = vld [vmem:[%s5117_s0] sm:$0x1]  ;;  %v2212_v40 = vld [vmem:[#allocation4] sm:$0x1] }
 0xb21   : > { %v2451_v30 = vpack.c.bf16 %v2447_v29, %v2447_v29  ;;  %v2205_v29 = vld [vmem:[%s5116_s27] sm:$0x1] }
 0xb22   : > { %v2450_v38 = vpack.c.bf16 %v2446_v34, %v2446_v34 }
 0xb23   : > { %3212 = vmatmul.msk.bf16.vlgmr.msra.gmra.mxu2 %vm1739_vm3, %v2451_v30 }
 0xb2a   : > { %v2467_v31 = vpop.f32.mrf.mxu3 }
 0xb2b   : > { %v2528_v33 = vpack.c.bf16 %v2467_v31, %v2467_v31 }
 0xb2d   : > { %3213 = vmatmul.msk.bf16.vlgmr.msra.gmra.mxu3 %vm1739_vm3, %v2528_v33 }
 0xb2f   : > { %v2324_v35 = vpop.permute.xlu1 %2323 }
 0xb30   : > { %v2494_v36 = vsel %vm1867_vm4, %v2324_v35, 0  ;;  %v2211_v35 = vld [vmem:[%s5118_s23] sm:$0x1] }
 0xb31   : > { %2503 = vmatpush.bf16.msra.mxu1 %v2494_v36 }
 0xb32   : > { %v2469_v37 = vpop.f32.mrf.mxu3 }
 0xb34   : > { %3211 = vmatmul.msk.bf16.vlgmr.msra.gmra.mxu1 %vm1739_vm3, %v2450_v38 }
 0xb35   : > { %2583 = vmatpush.bf16.msrb.mxu1 %v2574_v44 }
 0xb9c   : > { %v2486_v45 = vpop.f32.mrf.mxu0 }
 0xb9d   : > { %v2529_v46 = vpack.c.bf16 %v2486_v45, %v2486_v45 }
 0xb9f   : > { %3214 = vmatmul.msk.bf16.vlgmr.msrb.gmra.mxu0 %vm1739_vm3, %v2529_v46 }
 0xba4   : > { %v2488_v47 = vpop.f32.mrf.mxu0 }
 0xba6   : > { %v2524_v48 = vpop.f32.mrf.mxu2 }
 0xba7   : > { %v2531_v49 = vpack.c.bf16 %v2524_v48, %v2524_v48 }
 0xba9   : > { %3216 = vmatmul.msk.bf16.vlgmr.msrb.gmra.mxu2 %vm1739_vm3, %v2531_v49 }
 0xbae   : > { %v2526_v50 = vpop.f32.mrf.mxu2 }
 0xbb0   : > { %v2547_v51 = vpop.f32.mrf.mxu3 }
 0xbb1   : > { %v2505_v52 = vpop.f32.mrf.mxu1  ;;  %v2609_v60 = vsel %vm2608_vm14, %v2547_v51, 0.0 }
 0xbb2   : > { %v2530_v53 = vpack.c.bf16 %v2505_v52, %v2505_v52 }
 0xbb4   : > { %3215 = vmatmul.msk.bf16.vlgmr.msrb.gmra.mxu1 %vm1739_vm3, %v2530_v53  ;;  %vm2677_vm3 = vcmask 0  }
 0xbb8   : > { %v2549_v54 = vpop.f32.mrf.mxu3 }
 0xbb9   : > { %v2507_v55 = vpop.f32.mrf.mxu1 }
 0xc1c   : > { %v2566_v56 = vpop.f32.mrf.mxu0 }
 0xc1d   : > { %v2610_v59 = vsel %vm2608_vm14, %v2566_v56, 0.0 }
 0xc1e   : > { %v2611_v61 = vadd.f32 %v2610_v59, %v2609_v60 }
 0xc24   : > { %v2568_v57 = vpop.f32.mrf.mxu0 }
 0xc2c   : > { %v2604_v58 = vpop.f32.mrf.mxu2 }
 0xc2d   : > { %v2614_v1 = vsel %vm2608_vm14, %v2604_v58, 0.0 }
 0xc31   : > { %v2585_v62 = vpop.f32.mrf.mxu1 }
 0xc32   : > { %v2612_v63 = vsel %vm2608_vm14, %v2585_v62, 0.0 }
 0xc33   : > { %v2613_v0 = vadd.f32 %v2612_v63, %v2611_v61 }
 0xc34   : > { %v2606_v2 = vpop.f32.mrf.mxu2 }
 0xc35   : > { %v2615_v4 = vadd.f32 %v2614_v1, %v2613_v0 }
 0xc37   : > { %v2616_v5 = vadd.f32 %v2615_v4, %v2203_v3 }
 0xc39   : > { %v2587_v7 = vpop.f32.mrf.mxu1  ;;  %v2617_v8 = vadd.f32 %v2616_v5, %v4864_v12 }
 0xc3b   : > { %v2618_v9 = vsel %vm2608_vm14, %v2617_v8, 0.0 }
 0xc3c   : > { %2619 = vadd.xlane.f32.xlu2 %v2618_v9 }
 0xcaf   : > { %v2620_v10 = vpop.xlane.xlu2 %2619 }
 0xcb0   : > { %v2621_v6 = vmul.f32 %v2620_v10, %v4832_v11 }
 0xcb2   : > { %v2622_v13 = vsub.f32 %v2617_v8, %v2621_v6 }
 0xcb4   : > { %v2623_v14 = vmul.f32 %v2622_v13, %v2622_v13 }
 0xcb6   : > { %v2624_v15 = vsel %vm2608_vm14, %v2623_v14, 0.0 }
 0xcb7   : > { %2625 = vadd.xlane.f32.xlu0 %v2624_v15 }
 0xd2a   : > { %v2626_v18 = vpop.xlane.xlu0 %2625 }
 0xd2b   : > { %v2627_v12 = vmul.f32 %v2626_v18, %v4832_v11 }
 0xd2d   : > { %v2628_v19 = vadd.f32 1e-05, %v2627_v12 }
 0xd2f   : > { %3512 = vrsqrt.f32 %v2628_v19  ;;  %vm2635_vm0 = vweird.f32 %v2628_v19 }
 0xd35   : > { %v3513_v20 = vpop.eup %3512 }
 0xd36   : > { %v2630_v21 = vmul.f32 %v3513_v20, %v2628_v19  ;;  %vm2636_vm15 = vweird.f32 %v3513_v20 }
 0xd37   : > { %vm2637_vm1 = vmor %vm2635_vm0, %vm2636_vm15 }
 0xd38   : > { %v2631_v22 = vmul.f32 %v3513_v20, %v2630_v21 }
 0xd3a   : > { %v2632_v23 = vmul.f32 0.5, %v2631_v22 }
 0xd3c   : > { %v2633_v24 = vsub.f32 1.5, %v2632_v23 }
 0xd3e   : > { %v2634_v25 = vmul.f32 %v3513_v20, %v2633_v24 }
 0xd40   : > { %v2638_v26 = vsel %vm2637_vm1, %v3513_v20, %v2634_v25 }
 0xd41   : > { %v2639_v28 = vmul.f32 %v2638_v26, %v2622_v13 }
 0xd43   : > { %v2640_v30 = vmul.f32 %v2639_v28, %v2204_v27 }
 0xd45   : > { %v2641_v31 = vadd.f32 %v2640_v30, %v2205_v29 }
 0xd47   : > { %v2642_v11 = vpack.c.bf16 %v2641_v31, %v2641_v31 }
 0xd49   : > { %3225 = vmatmul.msk.bf16.vlgmr.msrb.gmra.mxu3 %vm1642_vm2, %v2642_v11 }
 0xdcc   : > { %v2667_v33 = vpop.f32.mrf.mxu3 }
 0xdcd   : > { %v2668_v34 = vadd.f32 %v2667_v33, %v2210_v32 }
 0xdcf   : > { %v2671_v36 = vmax.f32 %v2668_v34, 0.0 }
 0xdd1   : > { %v2672_v37 = vmul.f32 %v2671_v36, %v2211_v35 }
 0xdd3   : > { %v2673_v38 = vsel %vm2608_vm14, %v2672_v37, 0.0 }
 0xdd4   : > { %v2669_v39 = vpop.f32.mrf.mxu3  ;;  %2674 = vadd.xlane.f32.xlu1 %v2673_v38 }
 0xe47   : > { %v2675_v41 = vpop.xlane.xlu1 %2674 }
 0xe48   : > { %v2676_v42 = vadd.f32 %v2675_v41, %v2212_v40 }
 0xe4a   : > { %2678 = vst.msk [vmem:[%s1574_s14] sm:$0x1] %vm2677_vm3, %v2676_v42 }
 0xe4b PF: > { %s83_s18 = sadd.s32 1, %s4138_s18   ;;  %s5120_s28 = sld [smem:[#allocation61_spill]] }
 0xe4c   : > { %p80_p12 = scmp.ge.s32.totalorder %s83_s18, 6   ;;  %s5121_s10 = sld [smem:[#allocation69_spill]] }
 0xe4d   : > { %s5122_s7 = sld [smem:[#allocation62_spill]]  ;;  %s5126_s1 = smov %s4106_s2 }
 0xe4e   : > { %s5123_s12 = sld [smem:[#allocation70_spill]]  ;;  %s5131_s29 = smov %s4134_s16 }
 0xe4f   : > { %s5124_s13 = sld [smem:[#allocation65_spill]] }
 0xe50   : > { %s5125_s22 = sld [smem:[#allocation67_spill]] }
 0xe51   : > { %5130 = sst [smem:[#allocation61_spill]] %s4130_s15 }
 0xe52   : > { %s5127_s2 = smov %s5121_s10  ;;  %s5128_s10 = smov %s4118_s11 }
 0xe53   :  { %82 = sbr.rel (!%p80_p12) target bundleno = 75 (0x4b), region = 392 }
 0xe54   : > { %s5129_s11 = smov %s5123_s12 }
 0xe55   : > { %s5132_s15 = smov %s5124_s13 }
 0xe56   : > { %s5133_s16 = smov %s5125_s22 }
 0xe58   :  { %2696 = vsyncpa [#allocation6], 1 }
 0xe59   :  { %2698 = vsyncpa [#allocation6 + $0x1], 1 }
 0xe5a   :  { %2699 = vsyncpa [#allocation8], 1 }
 0xe5b   :  { %2700 = vsyncpa [#allocation23], 1 }
 0xe5c   :  { %2701 = vsyncpa [#allocation26], 1 }

</bundles_post_ra>
